<compile_context>
chip_gen: v6e
topology: v6e:2x2x1
jax: 0.10.0
libtpu: 0.0.40
codegen_flags: <defaults>
</compile_context>

<pallas_src>
import math

import jax
import jax.numpy as jnp
from jax.experimental import pallas as pl
from jax.experimental.pallas import tpu as pltpu

_GELU_C = math.sqrt(2.0 / math.pi)
_GELU_C3 = _GELU_C * 0.044715


# ----------------------------------------------------------------------------
# Kernel
# ----------------------------------------------------------------------------
def _ffn_kernel(x_ref, w1_ref, b1_ref, w2_ref, b2_ref, o_ref, acc_ref):
    # x_ref:  (TM, Dp) bf16     w1_ref: (Dp, TH) bf16   b1_ref: (1, TH) f32
    # w2_ref: (TH, Dp) bf16     b2_ref: (1, Dp)  f32
    # o_ref:  (TM, Dp) out dtype; acc_ref: (TM, Dp) f32 scratch accumulator
    k = pl.program_id(1)

    @pl.when(k == 0)
    def _():
        # Fold b2 into the accumulator init (removes an epilogue add + read).
        acc_ref[...] = jnp.broadcast_to(b2_ref[...], acc_ref.shape)

    # Linear 1 chunk: bf16 MXU matmul with f32 accumulation, bias in f32.
    h = jnp.dot(x_ref[...], w1_ref[...], preferred_element_type=jnp.float32)
    h = h + b1_ref[...]

    # tanh-approx GELU (matches the PyTorch module), f32, constants folded:
    #   tanh(c*(h + 0.044715*h^3)) == tanh(h*(c + c*0.044715*h^2))
    h2 = h * h
    g = 0.5 * h * (1.0 + jnp.tanh(h * (_GELU_C + _GELU_C3 * h2)))

    # Linear 2 chunk: cast activation to bf16 for the MXU, accumulate in f32.
    acc_ref[...] += jnp.dot(g.astype(w2_ref.dtype), w2_ref[...],
                            preferred_element_type=jnp.float32)

    @pl.when(k == pl.num_programs(1) - 1)
    def _():
        o_ref[...] = acc_ref[...].astype(o_ref.dtype)


# ----------------------------------------------------------------------------
# Tiling / VMEM heuristics
# ----------------------------------------------------------------------------
def _round_up(x, m):
    return (x + m - 1) // m * m


def _vmem_capacity_bytes():
    try:
        info = pltpu.get_tpu_info()
        cap = getattr(info, "vmem_capacity_bytes", None)
        if cap:
            return int(cap)
    except Exception:
        pass
    return 64 * 1024 * 1024  # conservative fallback (v7x per-TC size)


def _vmem_estimate(tile_m, tile_h, dp, out_bytes):
    w = 2 * 2 * (dp * tile_h * 2)        # w1 + w2 bf16 tiles, double-buffered
    x = 2 * tile_m * dp * 2              # x bf16 tile, double-buffered
    o = 2 * tile_m * dp * out_bytes      # output tile, double-buffered
    acc = tile_m * dp * 4                # f32 accumulator scratch
    tmp = 2 * tile_m * tile_h * 4        # h / gelu f32 temporaries
    b = 2 * (tile_h + dp) * 4 * 2        # biases, double-buffered
    return w + x + o + acc + tmp + b


def _select_tiles(n, d, h, out_bytes, budget):
    dp = _round_up(d, 128)
    hp = _round_up(h, 128)
    n8 = _round_up(max(n, 1), 8)

    def fits(tm, th):
        return _vmem_estimate(tm, th, dp, out_bytes) <= budget

    m_cands = sorted({m for m in (1024, 768, 512, 384, 256, 128, 64, 32, 16, 8, n8)
                      if m <= n8}, reverse=True)
    h_cands = sorted({c for c in (1024, 512, 256, 128) if c <= hp and hp % c == 0},
                     reverse=True)

    # Option A: full weights resident in VMEM (single reduction step).  Weights
    # are DMA'd once and reused for every token tile -> MXU-bound.
    for tm in m_cands:
        if fits(tm, hp):
            # Megacore (v7x): if only one token tile would exist, split it so
            # both TensorCores get work; free because weights aren't re-streamed.
            if tm >= n8 and n8 >= 256:
                tm2 = _round_up((n8 + 1) // 2, 8)
                if fits(tm2, hp):
                    tm = tm2
            return tm, hp

    # Option B: stream weight chunks.  Maximize tile_m first (arithmetic
    # intensity ≈ tile_m FLOP per weight byte), then tile_h (fewer grid steps).
    for tm in m_cands:
        for th in h_cands:
            if fits(tm, th):
                return tm, th
    return 8, 128


# ----------------------------------------------------------------------------
# Parameter preparation (cast + pad ONCE, not per forward call)
# ----------------------------------------------------------------------------
def prepare_params(w1, b1, w2, b2, *, compute_dtype=jnp.bfloat16):
    """w1: [D, H], b1: [H], w2: [H, D], b2: [D]  (H = 4*D)."""
    D, H = w1.shape
    assert w2.shape == (H, D) and b1.shape == (H,) and b2.shape == (D,)
    Dp = _round_up(D, 128)
    Hp = _round_up(H, 128)
    w1p = jnp.pad(w1, ((0, Dp - D), (0, Hp - H))).astype(compute_dtype)
    w2p = jnp.pad(w2, ((0, Hp - H), (0, Dp - D))).astype(compute_dtype)
    b1p = jnp.pad(b1, (0, Hp - H)).astype(jnp.float32).reshape(1, Hp)
    b2p = jnp.pad(b2, (0, Dp - D)).astype(jnp.float32).reshape(1, Dp)
    return {"w1": w1p, "b1": b1p, "w2": w2p, "b2": b2p,
            "D": D, "H": H, "compute_dtype": compute_dtype}


# ----------------------------------------------------------------------------
# Forward
# ----------------------------------------------------------------------------
def feed_forward(x, params, *, tile_m=None, tile_h=None,
                 vmem_headroom_bytes=12 * 1024 * 1024):
    """x: [..., D].  params: output of prepare_params()."""
    w1p, b1p, w2p, b2p = params["w1"], params["b1"], params["w2"], params["b2"]
    D, H = params["D"], params["H"]
    compute_dtype = params["compute_dtype"]
    Dp, Hp = w1p.shape

    orig_shape = x.shape
    out_dtype = x.dtype
    assert orig_shape[-1] == D

    x2 = x.reshape(-1, D)
    N = x2.shape[0]
    out_bytes = jnp.dtype(out_dtype).itemsize

    # VMEM limit: physical capacity minus headroom for Mosaic internal scratch.
    cap = _vmem_capacity_bytes()
    vmem_limit = max(cap - vmem_headroom_bytes, 32 * 1024 * 1024)
    budget = int(vmem_limit * 0.9)

    tm, th = _select_tiles(N, D, H, out_bytes, budget)
    if tile_m is not None:
        tm = _round_up(max(8, min(tile_m, _round_up(N, 8))), 8)
    if tile_h is not None:
        th = tile_h
        assert th % 128 == 0 and Hp % th == 0, "tile_h must divide padded H"

    # Pad tokens to a tile_m multiple (zero padding is exact through this FFN).
    Np = _round_up(max(N, 1), tm)
    xp = jnp.pad(x2, ((0, Np - N), (0, Dp - D))).astype(compute_dtype)

    grid = (Np // tm, Hp // th)

    out = pl.pallas_call(
        _ffn_kernel,
        out_shape=jax.ShapeDtypeStruct((Np, Dp), out_dtype),
        grid_spec=pltpu.PrefetchScalarGridSpec(
            num_scalar_prefetch=0,
            grid=grid,
            in_specs=[
                pl.BlockSpec((tm, Dp), lambda i, k: (i, 0)),    # x tile
                pl.BlockSpec((Dp, th), lambda i, k: (0, k)),    # w1 chunk
                pl.BlockSpec((1, th), lambda i, k: (0, k)),     # b1 chunk
                pl.BlockSpec((th, Dp), lambda i, k: (k, 0)),    # w2 chunk
                pl.BlockSpec((1, Dp), lambda i, k: (0, 0)),     # b2
            ],
            out_specs=pl.BlockSpec((tm, Dp), lambda i, k: (i, 0)),
            scratch_shapes=[pltpu.VMEM((tm, Dp), jnp.float32)],
        ),
        compiler_params=pltpu.CompilerParams(
            dimension_semantics=("parallel", "arbitrary"),
            vmem_limit_bytes=int(vmem_limit),
        ),
    )(xp, w1p, b1p, w2p, b2p)

    return out[:N, :D].reshape(orig_shape)


# ----------------------------------------------------------------------------
# Init + reference + test
# ----------------------------------------------------------------------------
def init_params(key, dim):
    """Deterministic init mimicking nn.Linear's U(-1/sqrt(fan_in), 1/sqrt(fan_in))."""
    hidden = 4 * dim
    k1, k2, k3, k4 = jax.random.split(key, 4)
    bound1 = 1.0 / math.sqrt(dim)
    bound2 = 1.0 / math.sqrt(hidden)
    # Stored transposed relative to PyTorch (we compute x @ W, PyTorch does x @ W.T)
    w1 = jax.random.uniform(k1, (dim, hidden), jnp.float32, -bound1, bound1)
    b1 = jax.random.uniform(k2, (hidden,), jnp.float32, -bound1, bound1)
    w2 = jax.random.uniform(k3, (hidden, dim), jnp.float32, -bound2, bound2)
    b2 = jax.random.uniform(k4, (dim,), jnp.float32, -bound2, bound2)
    return w1, b1, w2, b2


def reference(x, w1, b1, w2, b2, compute_dtype=jnp.bfloat16):
    """Pure-JAX reference mirroring the kernel's bf16-operand / f32-accum path."""
    xc = x.astype(compute_dtype)
    h = jnp.dot(xc, w1.astype(compute_dtype),
                preferred_element_type=jnp.float32) + b1
    g = 0.5 * h * (1.0 + jnp.tanh(_GELU_C * (h + 0.044715 * h ** 3)))
    y = jnp.dot(g.astype(compute_dtype), w2.astype(compute_dtype),
                preferred_element_type=jnp.float32) + b2
    return y.astype(x.dtype)


if __name__ == "__main__":
    key = jax.random.PRNGKey(0)
    kx1, kp1, kx2, kp2 = jax.random.split(key, 4)

    # Case 1: lane-aligned dims, auto tiling (weights VMEM-resident, k-grid = 1).
    batch, seq, dim = 2, 128, 128            # N = 256 tokens, hidden = 512
    x = jax.random.normal(kx1, (batch, seq, dim), jnp.float32)
    w1, b1, w2, b2 = init_params(kp1, dim)
    params = prepare_params(w1, b1, w2, b2)
    out = jax.block_until_ready(feed_forward(x, params))
    ref = reference(x, w1, b1, w2, b2)
    assert out.shape == x.shape
    assert jnp.allclose(out, ref, atol=2e-3, rtol=2e-3), "mismatch (aligned/auto case)"

    # Case 1b: same problem, forced weight-streaming path (multi-step reduction
    # exercises the pl.when init/accumulate/finalize logic).
    out = jax.block_until_ready(feed_forward(x, params, tile_m=128, tile_h=128))
    assert jnp.allclose(out, ref, atol=2e-3, rtol=2e-3), "mismatch (streamed case)"

    # Case 2: unaligned small dims; exercises the padding path.
    batch, seq, dim = 2, 10, 48              # N = 20 tokens, hidden = 192
    x = jax.random.normal(kx2, (batch, seq, dim), jnp.float32)
    w1, b1, w2, b2 = init_params(kp2, dim)
    params = prepare_params(w1, b1, w2, b2)
    out = jax.block_until_ready(feed_forward(x, params))
    ref = reference(x, w1, b1, w2, b2)
    assert out.shape == x.shape
    assert jnp.allclose(out, ref, atol=2e-3, rtol=2e-3), "mismatch (padded case)"

    print("KERNEL_OK")
</pallas_src>

<mosaic_0001>
module attributes {stable_mosaic.version = 11 : i64} {
  func.func @_ffn_kernel(%arg0: i32, %arg1: i32, %arg2: memref<128x128xbf16, #tpu.memory_space<vmem>>, %arg3: memref<128x512xbf16, #tpu.memory_space<vmem>>, %arg4: memref<1x512xf32, #tpu.memory_space<vmem>>, %arg5: memref<512x128xbf16, #tpu.memory_space<vmem>>, %arg6: memref<1x128xf32, #tpu.memory_space<vmem>>, %arg7: memref<128x128xf32, #tpu.memory_space<vmem>>, %arg8: memref<128x128xf32, #tpu.memory_space<vmem>>) attributes {dimension_semantics = [#tpu.dimension_semantics<parallel>, #tpu.dimension_semantics<arbitrary>], iteration_bounds = array<i64: 2, 1>, scalar_prefetch = 0 : i64, scratch_operands = 1 : i64, tpu.core_type = #tpu.core_type<tc>, window_params = [{transform_indices = @transform_0, window_bounds = array<i64: 128, 128>}, {transform_indices = @transform_1, window_bounds = array<i64: 128, 512>}, {transform_indices = @transform_2, window_bounds = array<i64: 1, 512>}, {transform_indices = @transform_3, window_bounds = array<i64: 512, 128>}, {pipeline_mode = #tpu.pipeline_mode<synchronous>, transform_indices = @transform_4, window_bounds = array<i64: 1, 128>}, {transform_indices = @transform_5, window_bounds = array<i64: 128, 128>}]} {
    %c0_i32 = arith.constant 0 : i32
    %0 = arith.cmpi eq, %arg1, %c0_i32 : i32
    %1 = arith.extui %0 : i1 to i32
    %c0_i32_0 = arith.constant 0 : i32
    %2 = arith.cmpi ne, %1, %c0_i32_0 : i32
    scf.if %2 {
      %c0_19 = arith.constant 0 : index
      %c0_20 = arith.constant 0 : index
      %30 = vector.load %arg6[%c0_19, %c0_20] : memref<1x128xf32, #tpu.memory_space<vmem>>, vector<1x128xf32>
      %31 = vector.shape_cast %30 : vector<1x128xf32> to vector<1x128xf32>
      %32 = vector.broadcast %31 : vector<1x128xf32> to vector<128x128xf32>
      %c0_21 = arith.constant 0 : index
      %c0_22 = arith.constant 0 : index
      %33 = vector.load %arg8[%c0_21, %c0_22] : memref<128x128xf32, #tpu.memory_space<vmem>>, vector<128x128xf32>
      tpu.vector_store %arg8[%c0_21, %c0_22], %32 {strides = array<i32>} : memref<128x128xf32, #tpu.memory_space<vmem>>, vector<128x128xf32>,
    } else {
    }
    %c0 = arith.constant 0 : index
    %c0_1 = arith.constant 0 : index
    %3 = vector.load %arg2[%c0, %c0_1] : memref<128x128xbf16, #tpu.memory_space<vmem>>, vector<128x128xbf16>
    %c0_2 = arith.constant 0 : index
    %c0_3 = arith.constant 0 : index
    %4 = vector.load %arg3[%c0_2, %c0_3] : memref<128x512xbf16, #tpu.memory_space<vmem>>, vector<128x512xbf16>
    %cst = arith.constant dense<0.000000e+00> : vector<128x512xf32>
    %5 = tpu.matmul %3, %4, %cst {dimension_numbers = #tpu.dot_dimension_numbers<[1], [0], [0], [1], [0, 0, 1, 1], [], []>} : vector<128x128xbf16>, vector<128x512xbf16>, vector<128x512xf32> -> vector<128x512xf32>
    %c0_4 = arith.constant 0 : index
    %c0_5 = arith.constant 0 : index
    %6 = vector.load %arg4[%c0_4, %c0_5] : memref<1x512xf32, #tpu.memory_space<vmem>>, vector<1x512xf32>
    %7 = vector.broadcast %6 : vector<1x512xf32> to vector<128x512xf32>
    %8 = arith.addf %5, %7 : vector<128x512xf32>
    %9 = arith.mulf %8, %8 : vector<128x512xf32>
    %cst_6 = arith.constant 5.000000e-01 : f32
    %10 = vector.broadcast %cst_6 : f32 to vector<128x512xf32>
    %11 = arith.mulf %10, %8 : vector<128x512xf32>
    %cst_7 = arith.constant 0.0356774069 : f32
    %12 = vector.broadcast %cst_7 : f32 to vector<128x512xf32>
    %13 = arith.mulf %12, %9 : vector<128x512xf32>
    %cst_8 = arith.constant 0.797884583 : f32
    %14 = vector.broadcast %cst_8 : f32 to vector<128x512xf32>
    %15 = arith.addf %14, %13 : vector<128x512xf32>
    %16 = arith.mulf %8, %15 : vector<128x512xf32>
    %17 = math.tanh %16 : vector<128x512xf32>
    %cst_9 = arith.constant 1.000000e+00 : f32
    %18 = vector.broadcast %cst_9 : f32 to vector<128x512xf32>
    %19 = arith.addf %18, %17 : vector<128x512xf32>
    %20 = arith.mulf %11, %19 : vector<128x512xf32>
    %c0_10 = arith.constant 0 : index
    %c0_11 = arith.constant 0 : index
    %21 = vector.load %arg8[%c0_10, %c0_11] : memref<128x128xf32, #tpu.memory_space<vmem>>, vector<128x128xf32>
    %22 = arith.truncf %20 : vector<128x512xf32> to vector<128x512xbf16>
    %c0_12 = arith.constant 0 : index
    %c0_13 = arith.constant 0 : index
    %23 = vector.load %arg5[%c0_12, %c0_13] : memref<512x128xbf16, #tpu.memory_space<vmem>>, vector<512x128xbf16>
    %cst_14 = arith.constant dense<0.000000e+00> : vector<128x128xf32>
    %24 = tpu.matmul %22, %23, %cst_14 {dimension_numbers = #tpu.dot_dimension_numbers<[1], [0], [0], [1], [0, 0, 1, 1], [], []>} : vector<128x512xbf16>, vector<512x128xbf16>, vector<128x128xf32> -> vector<128x128xf32>
    %25 = arith.addf %21, %24 : vector<128x128xf32>
    %c0_15 = arith.constant 0 : index
    %c0_16 = arith.constant 0 : index
    %26 = vector.load %arg8[%c0_15, %c0_16] : memref<128x128xf32, #tpu.memory_space<vmem>>, vector<128x128xf32>
    tpu.vector_store %arg8[%c0_15, %c0_16], %25 {strides = array<i32>} : memref<128x128xf32, #tpu.memory_space<vmem>>, vector<128x128xf32>,
    %c0_i32_17 = arith.constant 0 : i32
    %27 = arith.cmpi eq, %arg1, %c0_i32_17 : i32
    %28 = arith.extui %27 : i1 to i32
    %c0_i32_18 = arith.constant 0 : i32
    %29 = arith.cmpi ne, %28, %c0_i32_18 : i32
    scf.if %29 {
      %c0_19 = arith.constant 0 : index
      %c0_20 = arith.constant 0 : index
      %30 = vector.load %arg8[%c0_19, %c0_20] : memref<128x128xf32, #tpu.memory_space<vmem>>, vector<128x128xf32>
      %c0_21 = arith.constant 0 : index
      %c0_22 = arith.constant 0 : index
      %31 = vector.load %arg7[%c0_21, %c0_22] : memref<128x128xf32, #tpu.memory_space<vmem>>, vector<128x128xf32>
      tpu.vector_store %arg7[%c0_21, %c0_22], %30 {strides = array<i32>} : memref<128x128xf32, #tpu.memory_space<vmem>>, vector<128x128xf32>,
    } else {
    }
    return
  }
  func.func @transform_0(%arg0: i32, %arg1: i32) -> (i32, i32) {
    %c0_i32 = arith.constant 0 : i32
    %c0_i32_0 = arith.constant 0 : i32
    return %arg0, %c0_i32 : i32, i32
  }
  func.func @transform_1(%arg0: i32, %arg1: i32) -> (i32, i32) {
    %c0_i32 = arith.constant 0 : i32
    %c0_i32_0 = arith.constant 0 : i32
    return %c0_i32, %arg1 : i32, i32
  }
  func.func @transform_2(%arg0: i32, %arg1: i32) -> (i32, i32) {
    %c0_i32 = arith.constant 0 : i32
    %c0_i32_0 = arith.constant 0 : i32
    return %c0_i32, %arg1 : i32, i32
  }
  func.func @transform_3(%arg0: i32, %arg1: i32) -> (i32, i32) {
    %c0_i32 = arith.constant 0 : i32
    %c0_i32_0 = arith.constant 0 : i32
    return %arg1, %c0_i32 : i32, i32
  }
  func.func @transform_4(%arg0: i32, %arg1: i32) -> (i32, i32) {
    %c0_i32 = arith.constant 0 : i32
    %c0_i32_0 = arith.constant 0 : i32
    %c0_i32_1 = arith.constant 0 : i32
    return %c0_i32, %c0_i32_0 : i32, i32
  }
  func.func @transform_5(%arg0: i32, %arg1: i32) -> (i32, i32) {
    %c0_i32 = arith.constant 0 : i32
    %c0_i32_0 = arith.constant 0 : i32
    return %arg0, %c0_i32 : i32, i32
  }
}

</mosaic_0001>

<bundles_post_ra>
// kernel: tpu_custom_call.1
= control target key start
LH: loop header
LB: loop body
LE: loop exit
PB: predicated region body
PF: predicated region fallthrough
CT: control target
= control target key end

     0   :  { %s3839_s0 = inlined_call_operand.hbm [shape: bf16[256,128], index: 0, kind: input, shape index: {}]   ;;  %s3840_s1 = inlined_call_operand.hbm [shape: bf16[128,512], index: 1, kind: input, shape index: {}]   ;;  %s3841_s2 = inlined_call_operand.hbm [shape: f32[1,512], index: 2, kind: input, shape index: {}]   ;;  %s3842_s3 = inlined_call_operand.hbm [shape: bf16[512,128], index: 3, kind: input, shape index: {}]   ;;  %s3843_s4 = inlined_call_operand.vmem [shape: f32[1,128], index: 4, kind: input, shape index: {}]   ;;  %s3844_s5 = inlined_call_operand.hbm [shape: f32[256,128], index: 5, kind: output, shape index: {}]  }
   0x1   :  { %3858 = sst [smem:[#allocation51_spill]] %s3840_s1 }
   0x2   :  { %10 = vsyncpa [#allocation4], 0 }
   0x3   :  { %12 = vsyncpa [#allocation4 + $0x1], 0 }
   0x4   :  { %13 = vsyncpa [#allocation7], 0 }
   0x5   :  { %14 = vsyncpa [#allocation10], 0 }
   0x6   :  { %15 = vsyncpa [#allocation5], 0 }
   0x7   :  { %17 = vsyncpa [#allocation5 + $0x1], 0  ;;  %s2843_s18 = smov 0   ;;  %s2845_s19 = smov 0  }
   0x8   :  { %s2847_s20 = smov 0   ;;  %s2849_s21 = smov 0  }
   0x9   :  { %s2851_s22 = smov 0   ;;  %s2853_s23 = smov 0  }
   0xa LB: > { %s2065_s24 = sadd.s32 4294967295, %s2799_s23   ;;  %s2066_s25 = sadd.s32 4294967294, %s2799_s23   ;;  %s2799_s23 = sphi %s2853_s23, %s23_s23   ;;  %s2795_s22 = sphi %s2851_s22, %s3957_s22   ;;  %s2791_s21 = sphi %s2849_s21, %s3956_s21   ;;  %s2787_s20 = sphi %s2847_s20, %s3955_s20   ;;  %s2783_s19 = sphi %s2845_s19, %s3954_s19   ;;  %s2779_s18 = sphi %s2843_s18, %s3953_s18  }
   0xb   : > { %p55_p0 = scmp.ne.s32.totalorder %s2783_s19, %s2779_s18  ;;  %p2877_p1 = scmp.eq.s32.totalorder %s2065_s24, 0 }
   0xc   : > { %p2881_p2 = scmp.eq.s32.totalorder %s2065_s24, 1  ;;  %p184_p3 = scmp.eq.s32.totalorder %s2066_s25, 1 }
   0xd   : > { %s3859_s26 = scalar_select %p2877_p1, 1, 0 }
   0xe   : > { %p2887_p4 = por %p2877_p1, %p55_p0  ;;  %p2067_p5 = scmp.ge.s32.totalorder %s2799_s23, 1 }
   0xf   : > { %p2892_p6 = por %p184_p3, %p55_p0  ;;  %p191_p7 = scmp.lt.s32.totalorder %s2799_s23, 3 }
  0x10   : > { %s3861_s28 = scalar_select %p2887_p4, 1, 0 }
  0x11   : > { %s3862_s29 = scalar_select %p2892_p6, 1, 0 }
  0x12   : > { %p2897_p8 = pnand %p2067_p5, %p191_p7  ;;  %s2801_s6 = smov [#allocation6]  }
  0x13   : > { %s206_s7 = sshll.u32 %s2801_s6, 4  ;;  %s2802_s9 = smov [#allocation8]   ;;  %s207_s7 = int_to_ptr.vmem [resolvable:$true] %s206_s7 }
  0x14   : > { %s3863_s30 = scalar_select %p2897_p8, 1, 0 }
  0x15   : > { %p2305_p9 = pneg %p2897_p8  ;;  %s223_s10 = sshll.u32 %s2802_s9, 4  ;;  %s224_s10 = int_to_ptr.vmem [resolvable:$true] %s223_s10 }
  0x16   : > { %s2803_s11 = smov [#allocation9]   ;;  %s2616_s13 = scalar_lea.vmem %s207_s7, 4096 }
  0x17   : > { %p2906_p11 = pnand %p2305_p9, %p2877_p1  ;;  %s236_s12 = sshll.u32 %s2803_s11, 4  ;;  %s237_s12 = int_to_ptr.vmem [resolvable:$true] %s236_s12 }
  0x18   : > { %p2617_p13 = scmp.ne.s32.totalorder %s207_s7, %s2616_s13  ;;  %p2624_p5 = scmp.lt.s32.totalorder %s207_s7, %s207_s7 }
  0x19   : > { %p2607_p12 = pneg %p2906_p11  ;;  %p2625_p7 = scmp.lt.s32.totalorder %s2616_s13, %s2616_s13 }
  0x1b   : > { %p2619_p0 = pnand %p2617_p13, %p2607_p12  ;;  %p2626_p9 = por %p2625_p7, %p2624_p5 }
  0x1d   : > { %p2620_p3 = pneg %p2619_p0 }
  0x1f   : > { %p2627_p10 = pnand %p2626_p9, %p2620_p3 }
  0x21   : > { %2630 = shalt.err (!%p2627_p10)
}
  0x22   : > { %s2804_s14 = smov 256   ;;  %s2805_s15 = smov 16  }
  0x23   : > { %s3865_s1 = sld [smem:[#allocation51_spill]]  ;;  %s2642_s24 = scalar_lea.vmem %s224_s10, 64 }
  0x24   : > { %p2643_p6 = scmp.ne.s32.totalorder %s224_s10, %s2642_s24  ;;  %p2650_p1 = scmp.lt.s32.totalorder %s224_s10, %s224_s10 }
  0x25   : > { %p2651_p4 = scmp.lt.s32.totalorder %s2642_s24, %s2642_s24 }
  0x26   : > { %p2645_p13 = pnand %p2643_p6, %p2607_p12 }
  0x27   : > { %p2652_p5 = por %p2651_p4, %p2650_p1 }
  0x28   : > { %p2646_p0 = pneg %p2645_p13 }
  0x29   : > { %2308 = dma.hbm_to_vmem [thread:$0]  (!%p2906_p11), %s3865_s1, 4096, %s207_s7, [#allocation7], %s2804_s14, %s2804_s14, %s2805_s15  }
  0x2a   : > { %p2653_p3 = pnand %p2652_p5, %p2646_p0 }
  0x2c   : > { %2656 = shalt.err (!%p2653_p3)
}
  0x2d   : > { %2311 = dma.hbm_to_vmem [thread:$0]  (!%p2906_p11), %s3841_s2, 64, %s224_s10, [#allocation7]  }
  0x2e   : > { %s2668_s7 = scalar_lea.vmem %s237_s12, 4096  ;;  %p2676_p9 = scmp.lt.s32.totalorder %s237_s12, %s237_s12 }
  0x2f   : > { %p2669_p10 = scmp.ne.s32.totalorder %s237_s12, %s2668_s7  ;;  %p2677_p13 = scmp.lt.s32.totalorder %s2668_s7, %s2668_s7 }
  0x31   : > { %p2671_p7 = pnand %p2669_p10, %p2607_p12  ;;  %p2678_p8 = por %p2677_p13, %p2676_p9 }
  0x33   : > { %p2672_p6 = pneg %p2671_p7 }
  0x35   : > { %p2679_p1 = pnand %p2678_p8, %p2672_p6 }
  0x37   : > { %2682 = shalt.err (!%p2679_p1)
}
  0x38   : > { %s3849_s9 = smov 64   ;;  %s3850_s10 = smov 4  }
  0x39   : > { %2314 = dma.hbm_to_vmem [thread:$0]  (!%p2906_p11), %s3842_s3, 4096, %s237_s12, [#allocation10], %s3849_s9, %s3849_s9, %s3850_s10  }
  0x3a   : > { %s42_s14 = sadd.s32 1, %s2787_s20  ;;  %s35_s15 = sadd.s32 1, %s2795_s22 }
  0x3b   : > { %p49_p4 = scmp.ne.s32.totalorder %s2787_s20, %s2783_s19  ;;  %p37_p8 = scmp.ge.s32.totalorder %s35_s15, 2 }
  0x3c   : > { %p50_p12 = scmp.eq.s32.totalorder %s2799_s23, 0  ;;  %p2326_p5 = scmp.lt.s32.totalorder %s2799_s23, 2 }
  0x3d   : > { %p2946_p0 = por %p2881_p2, %p49_p4  ;;  %s3959_s15 = smov (%p37_p8, %s35_s15), 0 }
  0x3e   : > { %p51_p3 = por %p50_p12, %p49_p4  ;;  %s253_s8 = sand.u32 1, %s2787_s20  }
  0x3f   : > { %s39_s17 = ssub.s32 %s2795_s22, %s3959_s15  ;;  %s2072_s12 = sshll.u32 %s253_s8, 6 }
  0x40   : > { %p40_p10 = scmp.eq.s32.totalorder %s39_s17, 0  ;;  %s2159_s24 = sshll.u32 %s2795_s22, 10 }
  0x41   : > { %s263_s27 = scalar_lea.hbm %s3839_s0, %s2159_s24  ;;  %s257_s11 = scalar_lea.vmem [#allocation3], %s2072_s12 }
  0x42   : > { %s2958_s25 = scalar_select %p40_p10, %s2787_s20, %s42_s14  }
  0x43   : > { %s264_s13 = sshll.u32 %s257_s11, 4  ;;  %p2965_p2 = pnand %p2326_p5, %p51_p3  ;;  %s265_s13 = int_to_ptr.vmem [resolvable:$true] %s264_s13 }
  0x44   : > { %s254_s10 = scalar_lea.sflag [#allocation4], %s253_s8  ;;  %s2696_s17 = scalar_lea.vmem %s265_s13, 1024 }
  0x45   : > { %p2685_p11 = pneg %p2965_p2  ;;  %p2697_p7 = scmp.ne.s32.totalorder %s265_s13, %s2696_s17 }
  0x46   : > { %s2808_s14 = smov [#allocation3]  }
  0x47   : > { %p2699_p6 = pnand %p2697_p7, %p2685_p11  ;;  %s2701_s1 = sshll.u32 %s2808_s14, 4  ;;  %s2702_s1 = int_to_ptr.vmem [resolvable:$false] %s2701_s1 }
  0x48   : > { %s2703_s24 = scalar_lea.vmem %s2702_s1, 2048  ;;  %p2704_p13 = scmp.lt.s32.totalorder %s265_s13, %s2702_s1 }
  0x49   : > { %p2700_p9 = pneg %p2699_p6  ;;  %p2705_p1 = scmp.lt.s32.totalorder %s2703_s24, %s2696_s17 }
  0x4b   : > { %p2706_p4 = por %p2705_p1, %p2704_p13 }
  0x4d   : > { %p2707_p8 = pnand %p2706_p4, %p2700_p9 }
  0x4f   : > { %2710 = shalt.err (!%p2707_p8)
}
  0x50   : > { %s3868_s12 = smov 4   ;;  %s3869_s6 = smov 64  }
  0x51   : > { %2318 = dma.hbm_to_vmem [thread:$0]  (!%p2965_p2), %s263_s27, 1024, %s265_s13, %s254_s10, %s3869_s6, %s3869_s6, %s3868_s12  }
  0x52   : > { %p3870_p12 = scmp.ne.s32.totalorder %s3863_s30, 0 }
  0x54   : > { %276 = sbr.rel (%p3870_p12) target bundleno = 707 (0x2c3), region = 40 }
  0x59   : > { %s2979_s8 = sand.u32 1, %s2783_s19   ;;  %p3871_p5 = scmp.ne.s32.totalorder %s3861_s28, 0 }
  0x5a   : > { %s2076_s1 = sshll.u32 %s2979_s8, 6  ;;  %s279_s7 = scalar_lea.sflag [#allocation4], %s2979_s8 }
  0x5b   : > { %s2983_s11 = scalar_lea.vmem [#allocation3], %s2076_s1 }
  0x5c   : > { %2762 = dma.done.wait (%p3871_p5), %s279_s7, 1024  }
  0x5d   : > { %2764 = vsyncadd (%p3871_p5), %s279_s7, 4294966272  ;;  %p3872_p3 = scmp.ne.s32.totalorder %s3859_s26, 0 }
  0x5f   : > { %2766 = dma.done.wait (%p3872_p3), [#allocation7], 4160  }
  0x60   : > { %2768 = vsyncadd (%p3872_p3), [#allocation7], 4294963136 }
  0x61   : > { %2770 = dma.done.wait (%p3872_p3), [#allocation10], 4096  }
  0x62   : > { %2772 = vsyncadd (%p3872_p3), [#allocation10], 4294963200  ;;  %v2809_v0 = vmov 0   ;;  %v2389_v1 = vld [vmem:[#allocation6 + $0xe4] ss:$16 sps:$4 sm:$0xff]   ;;  %v2445_v34 = vld [vmem:[#allocation9 + $0x78] sm:$0xff]  }
  0x63   : > { %664 = vmatprep.mubr.bf16.mxu0 %v2809_v0  ;;  %777 = vmatprep.mubr.bf16.mxu1 %v2809_v0  ;;  %v2391_v2 = vld [vmem:[#allocation6 + $0xec] ss:$16 sps:$4 sm:$0xff]   ;;  %v2393_v3 = vld [vmem:[#allocation6 + $0xe0] ss:$16 sps:$4 sm:$0xff]   ;;  %v2394_v4 = vld [vmem:[#allocation6 + $0xe8] ss:$16 sps:$4 sm:$0xff]  }
  0x64   : > { %632 = vmatprep.subr.bf16.mxu0 %v2389_v1  ;;  %745 = vmatprep.subr.bf16.mxu1 %v2391_v2  ;;  %v2395_v5 = vld [vmem:[#allocation6 + $0xc4] ss:$16 sps:$4 sm:$0xff]   ;;  %v2397_v6 = vld [vmem:[#allocation6 + $0xcc] ss:$16 sps:$4 sm:$0xff]   ;;  %v2399_v7 = vld [vmem:[#allocation6 + $0xc0] ss:$16 sps:$4 sm:$0xff]  }
  0x65   : > { %633 = vmatpush1.bf16.msra.mxu0 %v2393_v3  ;;  %746 = vmatpush1.bf16.msra.mxu1 %v2394_v4  ;;  %v2400_v8 = vld [vmem:[#allocation6 + $0xc8] ss:$16 sps:$4 sm:$0xff]   ;;  %v2401_v9 = vld [vmem:[#allocation6 + $0xa4] ss:$16 sps:$4 sm:$0xff]   ;;  %v2403_v10 = vld [vmem:[#allocation6 + $0xac] ss:$16 sps:$4 sm:$0xff]  }
  0x66   : > { %634 = vmatprep.subr.bf16.mxu0 %v2395_v5  ;;  %747 = vmatprep.subr.bf16.mxu1 %v2397_v6  ;;  %v2405_v11 = vld [vmem:[#allocation6 + $0xa0] ss:$16 sps:$4 sm:$0xff]   ;;  %v2406_v12 = vld [vmem:[#allocation6 + $0xa8] ss:$16 sps:$4 sm:$0xff]   ;;  %v2407_v13 = vld [vmem:[#allocation6 + $0x84] ss:$16 sps:$4 sm:$0xff]  }
  0x67   : > { %v2409_v14 = vld [vmem:[#allocation6 + $0x8c] ss:$16 sps:$4 sm:$0xff]   ;;  %v2411_v15 = vld [vmem:[#allocation6 + $0x80] ss:$16 sps:$4 sm:$0xff]   ;;  %v2412_v16 = vld [vmem:[#allocation6 + $0x88] ss:$16 sps:$4 sm:$0xff]  }
  0x68   : > { %v2413_v17 = vld [vmem:[#allocation6 + $0x64] ss:$16 sps:$4 sm:$0xff]   ;;  %v2415_v18 = vld [vmem:[#allocation6 + $0x6c] ss:$16 sps:$4 sm:$0xff]   ;;  %v2417_v19 = vld [vmem:[#allocation6 + $0x60] ss:$16 sps:$4 sm:$0xff]  }
  0x69   : > { %635 = vmatpush1.bf16.msra.mxu0 %v2399_v7  ;;  %748 = vmatpush1.bf16.msra.mxu1 %v2400_v8  ;;  %v2418_v20 = vld [vmem:[#allocation6 + $0x68] ss:$16 sps:$4 sm:$0xff]   ;;  %v2419_v21 = vld [vmem:[#allocation6 + $0x44] ss:$16 sps:$4 sm:$0xff]   ;;  %v2421_v22 = vld [vmem:[#allocation6 + $0x4c] ss:$16 sps:$4 sm:$0xff]  }
  0x6a   : > { %636 = vmatprep.subr.bf16.mxu0 %v2401_v9  ;;  %749 = vmatprep.subr.bf16.mxu1 %v2403_v10  ;;  %v2423_v23 = vld [vmem:[#allocation6 + $0x40] ss:$16 sps:$4 sm:$0xff]   ;;  %v2424_v24 = vld [vmem:[#allocation6 + $0x48] ss:$16 sps:$4 sm:$0xff]   ;;  %v2425_v25 = vld [vmem:[#allocation6 + $0x24] ss:$16 sps:$4 sm:$0xff]   ;;  %v404_v9 = vlaneseq }
  0x6b   : > { %v2427_v26 = vld [vmem:[#allocation6 + $0x2c] ss:$16 sps:$4 sm:$0xff]   ;;  %v2429_v27 = vld [vmem:[#allocation6 + $0x20] ss:$16 sps:$4 sm:$0xff]   ;;  %v2430_v28 = vld [vmem:[#allocation6 + $0x28] ss:$16 sps:$4 sm:$0xff]  }
  0x6c   : > { %v2431_v29 = vld [vmem:[#allocation6 + $0x4] ss:$16 sps:$4 sm:$0xff]   ;;  %v2433_v30 = vld [vmem:[#allocation6 + $0xc] ss:$16 sps:$4 sm:$0xff]   ;;  %v2435_v31 = vld [vmem:[#allocation6] ss:$16 sps:$4 sm:$0xff]  }
  0x6d   : > { %637 = vmatpush1.bf16.msra.mxu0 %v2405_v11  ;;  %750 = vmatpush1.bf16.msra.mxu1 %v2406_v12  ;;  %v2436_v32 = vld [vmem:[#allocation6 + $0x8] ss:$16 sps:$4 sm:$0xff]   ;;  %v2437_v33 = vld [vmem:[%s2983_s11] sm:$0xff]   ;;  %v2453_v43 = vld [vmem:[#allocation9 + $0x68] sm:$0xff]   ;;  %v405_v10 = vshrl.u32 %v404_v9, 7  ;;  %s2080_s26 = sshll.u32 %s2979_s8, 7 }
  0x6e   : > { %638 = vmatprep.subr.bf16.mxu0 %v2407_v13  ;;  %751 = vmatprep.subr.bf16.mxu1 %v2409_v14  ;;  %v2446_v35 = vld [vmem:[#allocation9 + $0xf8] sm:$0xff]   ;;  %v2449_v38 = vld [vmem:[#allocation9 + $0x70] sm:$0xff]   ;;  %v2438_v41 = vld [vmem:[%s2983_s11 + $0x8] sm:$0xff]   ;;  %s3751_s9 = scalar_lea.vmem [#allocation11], %s2080_s26  ;;  %s2160_s10 = sshll.u32 %s2791_s21, 11 }
  0x6f   : > { %v2447_v36 = vld [vmem:[#allocation9 + $0x38] sm:$0xff]   ;;  %v2450_v39 = vld [vmem:[#allocation9 + $0xf0] sm:$0xff]   ;;  %v2454_v44 = vld [vmem:[#allocation9 + $0xe8] sm:$0xff]   ;;  %v406_v11 = vsub.s32 0, %v405_v10  ;;  %v414_v12 = vsub.s32 2, %v405_v10  ;;  %v410_v14 = vsub.s32 1, %v405_v10  ;;  %s3787_s14 = scalar_lea.hbm %s3844_s5, %s2160_s10 }
  0x70   : > { %v2448_v37 = vld [vmem:[#allocation9 + $0xb8] sm:$0xff]   ;;  %v2451_v40 = vld [vmem:[#allocation9 + $0x30] sm:$0xff]   ;;  %v2455_v45 = vld [vmem:[#allocation9 + $0x28] sm:$0xff]   ;;  %s1949_s27 = sshll.u32 %s3751_s9, 4  ;;  %s1936_s24 = scalar_lea.sflag [#allocation5], %s2979_s8  ;;  %s3789_s27 = int_to_ptr.vmem [resolvable:$true] %s1949_s27 }
  0x71   : > { %639 = vmatpush1.bf16.msra.mxu0 %v2411_v15  ;;  %752 = vmatpush1.bf16.msra.mxu1 %v2412_v16  ;;  %v2452_v42 = vld [vmem:[#allocation9 + $0xb0] sm:$0xff]   ;;  %v2456_v46 = vld [vmem:[#allocation9 + $0xa8] sm:$0xff]   ;;  %v2457_v47 = vld [vmem:[#allocation9 + $0x60] sm:$0xff]   ;;  %v418_v15 = vsub.s32 3, %v405_v10  ;;  %s2711_s12 = scalar_lea.vmem %s3789_s27, 2048  ;;  %s2810_s21 = smov [#allocation11]  }
  0x72   : > { %640 = vmatprep.subr.bf16.mxu0 %v2413_v17  ;;  %753 = vmatprep.subr.bf16.mxu1 %v2415_v18  ;;  %v2458_v48 = vld [vmem:[#allocation9 + $0xe0] sm:$0xff]   ;;  %v2439_v49 = vld [vmem:[%s2983_s11 + $0x10] sm:$0xff]   ;;  %v2440_v52 = vld [vmem:[%s2983_s11 + $0x18] sm:$0xff]   ;;  %p2712_p10 = scmp.ne.s32.totalorder %s3789_s27, %s2711_s12  ;;  %s2715_s6 = sshll.u32 %s2810_s21, 4  ;;  %s2716_s6 = int_to_ptr.vmem [resolvable:$false] %s2715_s6 }
  0x73   : > { %v2459_v50 = vld [vmem:[#allocation9 + $0x20] sm:$0xff]   ;;  %v2443_v55 = vld [vmem:[%s2983_s11 + $0x30] sm:$0xff]   ;;  %v2444_v56 = vld [vmem:[%s2983_s11 + $0x38] sm:$0xff]   ;;  %s2717_s1 = scalar_lea.vmem %s2716_s6, 4096  ;;  %p2718_p7 = scmp.lt.s32.totalorder %s3789_s27, %s2716_s6 }
  0x74   : > { %v2460_v51 = vld [vmem:[#allocation9 + $0xa0] sm:$0xff]   ;;  %v2461_v57 = vld [vmem:[#allocation9 + $0x58] sm:$0xff]   ;;  %v2465_v61 = vld [vmem:[#allocation9 + $0x50] sm:$0xff]   ;;  %p2713_p2 = pnand %p2712_p10, %p2946_p0  ;;  %p2719_p6 = scmp.lt.s32.totalorder %s2717_s1, %s2711_s12 }
  0x75   : > { %641 = vmatpush1.bf16.msra.mxu0 %v2417_v19  ;;  %754 = vmatpush1.bf16.msra.mxu1 %v2418_v20  ;;  %v2441_v53 = vld [vmem:[%s2983_s11 + $0x20] sm:$0xff]   ;;  %v2442_v54 = vld [vmem:[%s2983_s11 + $0x28] sm:$0xff]   ;;  %v2466_v62 = vld [vmem:[#allocation9 + $0xd0] sm:$0xff]  }
  0x76   : > { %642 = vmatprep.subr.bf16.mxu0 %v2419_v21  ;;  %755 = vmatprep.subr.bf16.mxu1 %v2421_v22  ;;  %v2462_v58 = vld [vmem:[#allocation9 + $0xd8] sm:$0xff]   ;;  %v2467_v63 = vld [vmem:[#allocation9 + $0x10] sm:$0xff]   ;;  %v2470_v2 = vld [vmem:[#allocation9 + $0xc8] sm:$0xff]   ;;  %p2714_p11 = pneg %p2713_p2  ;;  %p2720_p9 = por %p2719_p6, %p2718_p7 }
  0x77   : > { %v2463_v59 = vld [vmem:[#allocation9 + $0x18] sm:$0xff]   ;;  %v2468_v1 = vld [vmem:[#allocation9 + $0x90] sm:$0xff]   ;;  %v2471_v3 = vld [vmem:[#allocation9 + $0x8] sm:$0xff]  }
  0x78   : > { %v2464_v60 = vld [vmem:[#allocation9 + $0x98] sm:$0xff]   ;;  %v2472_v4 = vld [vmem:[#allocation9 + $0x88] sm:$0xff]   ;;  %v2473_v5 = vld [vmem:[#allocation9 + $0x40] sm:$0xff]   ;;  %p2721_p13 = pnand %p2720_p9, %p2714_p11 }
  0x79   : > { %643 = vmatpush1.bf16.msra.mxu0 %v2423_v23  ;;  %756 = vmatpush1.bf16.msra.mxu1 %v2424_v24  ;;  %v2474_v6 = vld [vmem:[#allocation9 + $0xc0] sm:$0xff]   ;;  %v402_v13 = vld [vmem:[#allocation8] sm:$0xf] }
  0x7a   : > { %644 = vmatprep.subr.bf16.mxu0 %v2425_v25  ;;  %757 = vmatprep.subr.bf16.mxu1 %v2427_v26  ;;  %v2475_v7 = vld [vmem:[#allocation9] sm:$0xff]   ;;  %v3021_v16 = vrot.slane %v402_v13, %v406_v11  ;;  %v3023_v17 = vrot.slane %v402_v13, %v414_v12  ;;  %v3025_v20 = vrot.slane %v402_v13, %v410_v14 }
  0x7b   : > { %v2476_v8 = vld [vmem:[#allocation9 + $0x80] sm:$0xff]   ;;  %v3027_v21 = vrot.slane %v402_v13, %v418_v15 }
  0x7d   : > { %645 = vmatpush1.bf16.msra.mxu0 %v2429_v27  ;;  %758 = vmatpush1.bf16.msra.mxu1 %v2430_v28 }
  0x7e   : > { %646 = vmatprep.subr.bf16.mxu0 %v2431_v29  ;;  %759 = vmatprep.subr.bf16.mxu1 %v2433_v30 }
  0x81   : > { %647 = vmatpush1.bf16.msra.mxu0 %v2435_v31  ;;  %760 = vmatpush1.bf16.msra.mxu1 %v2436_v32 }
  0x82   : > { %2161 = vmatprep.subr.bf16.mxu0 %v2445_v34  ;;  %2225 = vmatprep.subr.bf16.mxu1 %v2446_v35 }
  0x84   : > { %665 = vmatmul.mubr.bf16.vlgmr.msra.gmra.mxu0 %v2437_v33  ;;  %778 = vmatmul.mubr.bf16.vlgmr.msra.gmra.mxu1 %v2437_v33 }
  0x85   : > { %674 = vmatprep.mubr.bf16.mxu0 %v2809_v0  ;;  %787 = vmatprep.mubr.bf16.mxu1 %v2809_v0 }
  0x86   : > { %2162 = vmatpush3.bf16.msra.mxu0 %v2447_v36  ;;  %2226 = vmatpush3.bf16.msra.mxu1 %v2448_v37 }
  0x87   : > { %2163 = vmatprep.subr.bf16.mxu0 %v2449_v38  ;;  %2227 = vmatprep.subr.bf16.mxu1 %v2450_v39 }
  0x8a   : > { %2164 = vmatpush3.bf16.msra.mxu0 %v2451_v40  ;;  %2228 = vmatpush3.bf16.msra.mxu1 %v2452_v42 }
  0x8b   : > { %2165 = vmatprep.subr.bf16.mxu0 %v2453_v43  ;;  %2229 = vmatprep.subr.bf16.mxu1 %v2454_v44 }
  0x8c   : > { %675 = vmatmul.mubr.bf16.gmra.mxu0 %v2438_v41  ;;  %788 = vmatmul.mubr.bf16.gmra.mxu1 %v2438_v41 }
  0x8d   : > { %684 = vmatprep.mubr.bf16.mxu0 %v2809_v0  ;;  %797 = vmatprep.mubr.bf16.mxu1 %v2809_v0 }
  0x8e   : > { %2166 = vmatpush3.bf16.msra.mxu0 %v2455_v45  ;;  %2230 = vmatpush3.bf16.msra.mxu1 %v2456_v46 }
  0x8f   : > { %2167 = vmatprep.subr.bf16.mxu0 %v2457_v47  ;;  %2231 = vmatprep.subr.bf16.mxu1 %v2458_v48 }
  0x92   : > { %2168 = vmatpush3.bf16.msra.mxu0 %v2459_v50  ;;  %2232 = vmatpush3.bf16.msra.mxu1 %v2460_v51 }
  0x93   : > { %2169 = vmatprep.subr.bf16.mxu0 %v2461_v57  ;;  %2233 = vmatprep.subr.bf16.mxu1 %v2462_v58 }
  0x94   : > { %685 = vmatmul.mubr.bf16.gmra.mxu0 %v2439_v49  ;;  %798 = vmatmul.mubr.bf16.gmra.mxu1 %v2439_v49 }
  0x95   : > { %694 = vmatprep.mubr.bf16.mxu0 %v2809_v0  ;;  %807 = vmatprep.mubr.bf16.mxu1 %v2809_v0 }
  0x96   : > { %2170 = vmatpush3.bf16.msra.mxu0 %v2463_v59  ;;  %2234 = vmatpush3.bf16.msra.mxu1 %v2464_v60 }
  0x97   : > { %2171 = vmatprep.subr.bf16.mxu0 %v2465_v61  ;;  %2235 = vmatprep.subr.bf16.mxu1 %v2466_v62 }
  0x9a   : > { %2172 = vmatpush3.bf16.msra.mxu0 %v2467_v63  ;;  %2236 = vmatpush3.bf16.msra.mxu1 %v2468_v1 }
  0x9b   : > { %2237 = vmatprep.subr.bf16.mxu1 %v2470_v2 }
  0x9c   : > { %695 = vmatmul.mubr.bf16.gmra.mxu0 %v2440_v52  ;;  %808 = vmatmul.mubr.bf16.gmra.mxu1 %v2440_v52 }
  0x9d   : > { %704 = vmatprep.mubr.bf16.mxu0 %v2809_v0  ;;  %817 = vmatprep.mubr.bf16.mxu1 %v2809_v0 }
  0x9e   : > { %2238 = vmatpush3.bf16.msra.mxu1 %v2472_v4 }
  0x9f   : > { %2239 = vmatprep.subr.bf16.mxu1 %v2474_v6 }
  0xa2   : > { %2240 = vmatpush3.bf16.msra.mxu1 %v2476_v8 }
  0xa4   : > { %705 = vmatmul.mubr.bf16.gmra.mxu0 %v2441_v53  ;;  %818 = vmatmul.mubr.bf16.gmra.mxu1 %v2441_v53 }
  0xa5   : > { %714 = vmatprep.mubr.bf16.mxu0 %v2809_v0  ;;  %827 = vmatprep.mubr.bf16.mxu1 %v2809_v0 }
  0xac   : > { %715 = vmatmul.mubr.bf16.gmra.mxu0 %v2442_v54  ;;  %828 = vmatmul.mubr.bf16.gmra.mxu1 %v2442_v54 }
  0xad   : > { %724 = vmatprep.mubr.bf16.mxu0 %v2809_v0  ;;  %837 = vmatprep.mubr.bf16.mxu1 %v2809_v0 }
  0xb4   : > { %725 = vmatmul.mubr.bf16.gmra.mxu0 %v2443_v55  ;;  %838 = vmatmul.mubr.bf16.gmra.mxu1 %v2443_v55 }
  0xb5   : > { %734 = vmatprep.mubr.bf16.mxu0 %v2809_v0  ;;  %847 = vmatprep.mubr.bf16.mxu1 %v2809_v0  ;;  %v2469_v0 = vld [vmem:[#allocation9 + $0x48] sm:$0xff]  }
  0xb6   : > { %2173 = vmatprep.subr.bf16.mxu0 %v2469_v0 }
  0xb7   : > { %2174 = vmatpush3.bf16.msra.mxu0 %v2471_v3 }
  0xb8   : > { %2175 = vmatprep.subr.bf16.mxu0 %v2473_v5 }
  0xbb   : > { %2176 = vmatpush3.bf16.msra.mxu0 %v2475_v7 }
  0xbc   : > { %735 = vmatmul.mubr.bf16.gmra.mxu0 %v2444_v56  ;;  %848 = vmatmul.mubr.bf16.gmra.mxu1 %v2444_v56 }
 0x144   : > { %v666_v18 = vpop.f32.mrf.mxu0  ;;  %v779_v19 = vpop.f32.mrf.mxu1 }
 0x145   : > { %v667_v22 = vadd.f32 %v666_v18, %v3021_v16  ;;  %v780_v23 = vadd.f32 %v779_v19, %v3023_v17 }
 0x146   : > { %v668_v24 = vpop.f32.mrf.mxu0  ;;  %v781_v25 = vpop.f32.mrf.mxu1 }
 0x147   : > { %v858_v26 = vmul.f32 %v667_v22, %v667_v22  ;;  %v860_v27 = vmul.f32 %v780_v23, %v780_v23  ;;  %v3032_v28 = vadd.f32 %v668_v24, %v3025_v20  ;;  %v3035_v29 = vadd.f32 %v781_v25, %v3027_v21 }
 0x148   : > { %v670_v30 = vpop.f32.mrf.mxu0  ;;  %v783_v31 = vpop.f32.mrf.mxu1  ;;  %v3058_v7 = vmul.f32 0.5, %v667_v22  ;;  %v3066_v18 = vmul.f32 0.5, %v780_v23 }
 0x149   : > { %v986_v32 = vmul.f32 0.035677407, %v858_v26  ;;  %v988_v33 = vmul.f32 0.035677407, %v860_v27  ;;  %v3038_v34 = vadd.f32 %v670_v30, %v3021_v16  ;;  %v3041_v35 = vadd.f32 %v783_v31, %v3023_v17 }
 0x14a   : > { %v672_v36 = vpop.f32.mrf.mxu0  ;;  %v785_v37 = vpop.f32.mrf.mxu1  ;;  %v859_v44 = vmul.f32 %v3032_v28, %v3032_v28  ;;  %v861_v45 = vmul.f32 %v3035_v29, %v3035_v29  ;;  %v3069_v25 = vmul.f32 0.5, %v3032_v28 }
 0x14b   : > { %v1050_v38 = vadd.f32 0.7978846, %v986_v32  ;;  %v1052_v39 = vadd.f32 0.7978846, %v988_v33  ;;  %v862_v40 = vmul.f32 %v3038_v34, %v3038_v34  ;;  %v864_v41 = vmul.f32 %v3041_v35, %v3041_v35 }
 0x14c   : > { %v676_v42 = vpop.f32.mrf.mxu0  ;;  %v789_v43 = vpop.f32.mrf.mxu1  ;;  %v673_v47 = vadd.f32 %v672_v36, %v3025_v20  ;;  %v786_v50 = vadd.f32 %v785_v37, %v3027_v21  ;;  %v987_v58 = vmul.f32 0.035677407, %v859_v44  ;;  %v989_v59 = vmul.f32 0.035677407, %v861_v45 }
 0x14d   : > { %v990_v46 = vmul.f32 0.035677407, %v862_v40  ;;  %v1114_v48 = vmul.f32 %v1050_v38, %v667_v22  ;;  %v992_v49 = vmul.f32 0.035677407, %v864_v41  ;;  %v1116_v53 = vmul.f32 %v1052_v39, %v780_v23 }
 0x14e   : > { %v678_v51 = vpop.f32.mrf.mxu0  ;;  %v791_v52 = vpop.f32.mrf.mxu1  ;;  %v863_v56 = vmul.f32 %v673_v47, %v673_v47  ;;  %v865_v61 = vmul.f32 %v786_v50, %v786_v50  ;;  %v677_v62 = vadd.f32 %v676_v42, %v3021_v16  ;;  %v790_v63 = vadd.f32 %v789_v43, %v3023_v17 }
 0x14f   : > { %v1054_v54 = vadd.f32 0.7978846, %v990_v46  ;;  %v1056_v55 = vadd.f32 0.7978846, %v992_v49  ;;  %2477 = vtanh.f32 %v1114_v48  ;;  %v679_v0 = vadd.f32 %v678_v51, %v3025_v20 }
 0x150   : > { %v680_v57 = vpop.f32.mrf.mxu0  ;;  %v793_v60 = vpop.f32.mrf.mxu1  ;;  %2479 = vtanh.f32 %v1116_v53  ;;  %v991_v3 = vmul.f32 0.035677407, %v863_v56  ;;  %v866_v4 = vmul.f32 %v677_v62, %v677_v62  ;;  %v868_v5 = vmul.f32 %v790_v63, %v790_v63 }
 0x151   : > { %v1118_v1 = vmul.f32 %v1054_v54, %v3038_v34  ;;  %v1120_v2 = vmul.f32 %v1056_v55, %v3041_v35  ;;  %v1051_v9 = vadd.f32 0.7978846, %v987_v58  ;;  %v1053_v10 = vadd.f32 0.7978846, %v989_v59 }
 0x152   : > { %v682_v6 = vpop.f32.mrf.mxu0  ;;  %v795_v8 = vpop.f32.mrf.mxu1  ;;  %v993_v11 = vmul.f32 0.035677407, %v865_v61  ;;  %v867_v12 = vmul.f32 %v679_v0, %v679_v0  ;;  %v994_v13 = vmul.f32 0.035677407, %v866_v4  ;;  %v3061_v14 = vadd.f32 %v791_v52, %v3027_v21 }
 0x153   : > { %2481 = vtanh.f32 %v1118_v1  ;;  %v3064_v15 = vadd.f32 %v680_v57, %v3021_v16  ;;  %v1055_v19 = vadd.f32 0.7978846, %v991_v3  ;;  %v996_v24 = vmul.f32 0.035677407, %v868_v5 }
 0x154   : > { %2483 = vtanh.f32 %v1120_v2  ;;  %v686_v22 = vpop.f32.mrf.mxu0  ;;  %v995_v26 = vmul.f32 0.035677407, %v867_v12  ;;  %v869_v27 = vmul.f32 %v3061_v14, %v3061_v14  ;;  %v3074_v30 = vadd.f32 %v793_v60, %v3023_v17  ;;  %v799_v31 = vpop.f32.mrf.mxu1 }
 0x155   : > { %v1115_v32 = vmul.f32 %v1051_v9, %v3032_v28  ;;  %v3078_v23 = vmul.f32 0.5, %v3035_v29  ;;  %v1057_v33 = vadd.f32 0.7978846, %v993_v11  ;;  %v870_v36 = vmul.f32 %v3064_v15, %v3064_v15 }
 0x156   : > { %v1117_v37 = vmul.f32 %v1053_v10, %v3035_v29  ;;  %v3084_v38 = vmul.f32 0.5, %v3038_v34  ;;  %v3087_v39 = vmul.f32 0.5, %v3041_v35  ;;  %v1058_v40 = vadd.f32 0.7978846, %v994_v13  ;;  %v688_v44 = vpop.f32.mrf.mxu0  ;;  %v801_v34 = vpop.f32.mrf.mxu1 }
 0x157   : > { %v3089_v41 = vmul.f32 0.5, %v673_v47  ;;  %v1119_v42 = vmul.f32 %v1055_v19, %v673_v47  ;;  %v1060_v28 = vadd.f32 0.7978846, %v996_v24  ;;  %v3092_v43 = vadd.f32 %v682_v6, %v3025_v20 }
 0x158   : > { %v3094_v45 = vmul.f32 0.5, %v786_v50  ;;  %v1059_v46 = vadd.f32 0.7978846, %v995_v26  ;;  %v997_v48 = vmul.f32 0.035677407, %v869_v27  ;;  %v872_v29 = vmul.f32 %v3074_v30, %v3074_v30  ;;  %v803_v2 = vpop.f32.mrf.mxu1 }
 0x159   : > { %2485 = vtanh.f32 %v1115_v32  ;;  %v1121_v35 = vmul.f32 %v1057_v33, %v786_v50  ;;  %v998_v49 = vmul.f32 0.035677407, %v870_v36  ;;  %v3099_v51 = vadd.f32 %v795_v8, %v3027_v21  ;;  %v690_v50 = vpop.f32.mrf.mxu0 }
 0x15a   : > { %2487 = vtanh.f32 %v1117_v37  ;;  %v3101_v52 = vmul.f32 0.5, %v677_v62  ;;  %v1122_v53 = vmul.f32 %v1058_v40, %v677_v62  ;;  %v3103_v54 = vmul.f32 0.5, %v790_v63 }
 0x15b   : > { %2489 = vtanh.f32 %v1119_v42  ;;  %v1124_v56 = vmul.f32 %v1060_v28, %v790_v63  ;;  %v3105_v57 = vmul.f32 0.5, %v679_v0  ;;  %v871_v58 = vmul.f32 %v3092_v43, %v3092_v43  ;;  %v692_v11 = vpop.f32.mrf.mxu0 }
 0x15c   : > { %v2478_v47 = vpop.eup %2477  ;;  %v1123_v59 = vmul.f32 %v1059_v46, %v679_v0  ;;  %v1061_v60 = vadd.f32 0.7978846, %v997_v48  ;;  %v1000_v61 = vmul.f32 0.035677407, %v872_v29  ;;  %v3110_v1 = vadd.f32 %v686_v22, %v3021_v16  ;;  %v805_v22 = vpop.f32.mrf.mxu1 }
 0x15d   : > { %v2480_v55 = vpop.eup %2479  ;;  %2491 = vtanh.f32 %v1121_v35  ;;  %v1062_v62 = vadd.f32 0.7978846, %v998_v49  ;;  %v873_v3 = vmul.f32 %v3099_v51, %v3099_v51  ;;  %v3115_v63 = vadd.f32 %v799_v31, %v3023_v17 }
 0x15e   : > { %v1242_v4 = vadd.f32 1.0, %v2478_v47  ;;  %2493 = vtanh.f32 %v1122_v53  ;;  %v3118_v5 = vmul.f32 0.5, %v3061_v14  ;;  %v3121_v0 = vmul.f32 0.5, %v3064_v15  ;;  %v809_v29 = vpop.f32.mrf.mxu1 }
 0x15f   : > { %v1244_v8 = vadd.f32 1.0, %v2480_v55  ;;  %2495 = vtanh.f32 %v1124_v56  ;;  %v3124_v9 = vmul.f32 0.5, %v3074_v30  ;;  %v999_v10 = vmul.f32 0.035677407, %v871_v58 }
 0x160   : > { %v2482_v6 = vpop.eup %2481  ;;  %2497 = vtanh.f32 %v1123_v59  ;;  %v1125_v13 = vmul.f32 %v1061_v60, %v3061_v14  ;;  %v1064_v19 = vadd.f32 0.7978846, %v1000_v61  ;;  %v874_v24 = vmul.f32 %v3110_v1, %v3110_v1 }
 0x161   : > { %v2484_v12 = vpop.eup %2483  ;;  %v1126_v26 = vmul.f32 %v1062_v62, %v3064_v15  ;;  %v1001_v27 = vmul.f32 0.035677407, %v873_v3  ;;  %v876_v31 = vmul.f32 %v3115_v63, %v3115_v63  ;;  %v3133_v32 = vadd.f32 %v688_v44, %v3025_v20  ;;  %v696_v44 = vpop.f32.mrf.mxu0 }
 0x162   : > { %v3136_v33 = vmul.f32 %v1242_v4, %v3058_v7  ;;  %v1246_v36 = vadd.f32 1.0, %v2482_v6  ;;  %v3139_v14 = vmul.f32 0.5, %v3092_v43  ;;  %v3142_v37 = vadd.f32 %v801_v34, %v3027_v21  ;;  %v811_v3 = vpop.f32.mrf.mxu1 }
 0x163   : > { %v3145_v40 = vmul.f32 %v1244_v8, %v3066_v18  ;;  %v1248_v15 = vadd.f32 1.0, %v2484_v12  ;;  %v1063_v42 = vadd.f32 0.7978846, %v999_v10  ;;  %v3148_v28 = vadd.f32 %v690_v50, %v3021_v16  ;;  %v698_v60 = vpop.f32.mrf.mxu0 }
 0x164   : > { %2499 = vtanh.f32 %v1125_v13  ;;  %v1128_v7 = vmul.f32 %v1064_v19, %v3074_v30  ;;  %v3152_v46 = vmul.f32 0.5, %v3099_v51  ;;  %v1002_v48 = vmul.f32 0.035677407, %v874_v24 }
 0x165   : > { %2501 = vtanh.f32 %v1126_v26  ;;  %v1065_v34 = vadd.f32 0.7978846, %v1001_v27  ;;  %v1004_v35 = vmul.f32 0.035677407, %v876_v31  ;;  %v875_v18 = vmul.f32 %v3133_v32, %v3133_v32  ;;  %v700_v27 = vpop.f32.mrf.mxu0 }
 0x166   : > { %v3156_v49 = vpop.eup %2485  ;;  %v3159_v47 = vmul.f32 %v1246_v36, %v3084_v38  ;;  %v877_v53 = vmul.f32 %v3142_v37, %v3142_v37  ;;  %v3164_v30 = vadd.f32 %v803_v2, %v3023_v17  ;;  %v3167_v55 = vadd.f32 %v692_v11, %v3025_v20 }
 0x167   : > { %v3169_v56 = vpop.eup %2487  ;;  %v3172_v58 = vmul.f32 %v1248_v15, %v3087_v39  ;;  %v1127_v50 = vmul.f32 %v1063_v42, %v3092_v43  ;;  %v878_v38 = vmul.f32 %v3148_v28, %v3148_v28  ;;  %v3178_v59 = vadd.f32 %v805_v22, %v3027_v21 }
 0x168   : > { %v3180_v61 = vpop.eup %2489  ;;  %2503 = vtanh.f32 %v1128_v7  ;;  %v3183_v2 = vmul.f32 0.5, %v3110_v1  ;;  %v1066_v62 = vadd.f32 0.7978846, %v1002_v48  ;;  %v880_v39 = vmul.f32 %v3164_v30, %v3164_v30  ;;  %v813_v48 = vpop.f32.mrf.mxu1 }
 0x169   : > { %v1129_v43 = vmul.f32 %v1065_v34, %v3099_v51  ;;  %v1068_v4 = vadd.f32 0.7978846, %v1004_v35  ;;  %v1003_v6 = vmul.f32 0.035677407, %v875_v18  ;;  %v879_v8 = vmul.f32 %v3167_v55, %v3167_v55 }
 0x16a   : > { %3873 = vst [vmem:[#allocation16_spill] sm:$0xff] %v3183_v2  ;;  %v3190_v10 = vpop.eup %2491  ;;  %v3195_v12 = vmul.f32 0.5, %v3115_v63  ;;  %v1005_v13 = vmul.f32 0.035677407, %v877_v53  ;;  %v881_v19 = vmul.f32 %v3178_v59, %v3178_v59  ;;  %2505 = vtanh.f32 %v1127_v50 }
 0x16b   : > { %v3199_v24 = vpop.eup %2493  ;;  %v1006_v22 = vmul.f32 0.035677407, %v878_v38  ;;  %v3204_v26 = vadd.f32 %v696_v44, %v3021_v16  ;;  %v1130_v36 = vmul.f32 %v1066_v62, %v3110_v1  ;;  %v3210_v15 = vmul.f32 0.5, %v3133_v32 }
 0x16c   : > { %3874 = vst [vmem:[#allocation17_spill] sm:$0xff] %v3195_v12  ;;  %v3206_v31 = vpop.eup %2495  ;;  %v1008_v42 = vmul.f32 0.035677407, %v880_v39  ;;  %v3213_v7 = vadd.f32 %v809_v29, %v3023_v17  ;;  %2507 = vtanh.f32 %v1129_v43  ;;  %v1132_v35 = vmul.f32 %v1068_v4, %v3115_v63  ;;  %v702_v63 = vpop.f32.mrf.mxu0 }
 0x16d   : > { %3875 = vst [vmem:[#allocation18_spill] sm:$0xff] %v3210_v15  ;;  %v3215_v34 = vpop.eup %2497  ;;  %v1067_v44 = vadd.f32 0.7978846, %v1003_v6  ;;  %v1007_v18 = vmul.f32 0.035677407, %v879_v8  ;;  %v3219_v53 = vmul.f32 0.5, %v3142_v37  ;;  %v882_v29 = vmul.f32 %v3204_v26, %v3204_v26 }
 0x16e   : > { %v1069_v50 = vadd.f32 0.7978846, %v1005_v13  ;;  %v3222_v1 = vmul.f32 0.5, %v3148_v28  ;;  %v1009_v38 = vmul.f32 0.035677407, %v881_v19  ;;  %v3227_v39 = vadd.f32 %v698_v60, %v3025_v20  ;;  %v815_v13 = vpop.f32.mrf.mxu1 }
 0x16f   : > { %3876 = vst [vmem:[#allocation19_spill] sm:$0xff] %v3219_v53  ;;  %v1070_v62 = vadd.f32 0.7978846, %v1006_v22  ;;  %v3230_v43 = vadd.f32 %v811_v3, %v3027_v21  ;;  %2509 = vtanh.f32 %v1130_v36  ;;  %v1072_v4 = vadd.f32 0.7978846, %v1008_v42 }
 0x170   : > { %3877 = vst [vmem:[#allocation20_spill] sm:$0xff] %v3222_v1  ;;  %v884_v6 = vmul.f32 %v3213_v7, %v3213_v7  ;;  %v3235_v8 = vadd.f32 %v700_v27, %v3021_v16  ;;  %2511 = vtanh.f32 %v1132_v35  ;;  %v1131_v22 = vmul.f32 %v1067_v44, %v3133_v32  ;;  %v819_v2 = vpop.f32.mrf.mxu1 }
 0x171   : > { %v3237_v19 = vpop.eup %2499  ;;  %v1071_v60 = vadd.f32 0.7978846, %v1007_v18  ;;  %v883_v3 = vmul.f32 %v3227_v39, %v3227_v39  ;;  %v1133_v36 = vmul.f32 %v1069_v50, %v3142_v37  ;;  %v1073_v42 = vadd.f32 0.7978846, %v1009_v38  ;;  %v706_v18 = vpop.f32.mrf.mxu0 }
 0x172   : > { %v3242_v51 = vpop.eup %2501  ;;  %v885_v11 = vmul.f32 %v3230_v43, %v3230_v43  ;;  %v3248_v27 = vadd.f32 %v813_v48, %v3023_v17  ;;  %v1134_v12 = vmul.f32 %v1070_v62, %v3148_v28  ;;  %v3252_v35 = vmul.f32 0.5, %v3164_v30 }
 0x173   : > { %v3255_v32 = vmul.f32 0.5, %v3167_v55  ;;  %v1010_v44 = vmul.f32 0.035677407, %v882_v29  ;;  %v1136_v1 = vmul.f32 %v1072_v4, %v3164_v30  ;;  %v1012_v37 = vmul.f32 0.035677407, %v884_v6 }
 0x174   : > { %3878 = vst [vmem:[#allocation21_spill] sm:$0xff] %v3252_v35  ;;  %v1011_v50 = vmul.f32 0.035677407, %v883_v3  ;;  %v886_v38 = vmul.f32 %v3235_v8, %v3235_v8  ;;  %2513 = vtanh.f32 %v1131_v22  ;;  %v1135_v28 = vmul.f32 %v1071_v60, %v3167_v55  ;;  %v708_v60 = vpop.f32.mrf.mxu0 }
 0x175   : > { %3879 = vst [vmem:[#allocation22_spill] sm:$0xff] %v3255_v32  ;;  %v3260_v48 = vpop.eup %2503  ;;  %v3264_v62 = vmul.f32 0.5, %v3178_v59  ;;  %v3267_v35 = vadd.f32 %v702_v63, %v3025_v20  ;;  %2515 = vtanh.f32 %v1133_v36  ;;  %v1137_v30 = vmul.f32 %v1073_v42, %v3178_v59  ;;  %v821_v59 = vpop.f32.mrf.mxu1 }
 0x176   : > { %v1013_v29 = vmul.f32 0.035677407, %v885_v11  ;;  %v888_v4 = vmul.f32 %v3248_v27, %v3248_v27  ;;  %2517 = vtanh.f32 %v1134_v12  ;;  %v3273_v6 = vmul.f32 0.5, %v3204_v26 }
 0x177   : > { %3880 = vst [vmem:[#allocation23_spill] sm:$0xff] %v3264_v62  ;;  %v1074_v22 = vadd.f32 0.7978846, %v1010_v44  ;;  %v3276_v55 = vadd.f32 %v815_v13, %v3027_v21  ;;  %v3278_v3 = vpop.eup %2505  ;;  %2519 = vtanh.f32 %v1136_v1  ;;  %v1076_v63 = vadd.f32 0.7978846, %v1012_v37 }
 0x178   : > { %3881 = vst [vmem:[#allocation24_spill] sm:$0xff] %v3273_v6  ;;  %v1075_v36 = vadd.f32 0.7978846, %v1011_v50  ;;  %v1014_v62 = vmul.f32 0.035677407, %v886_v38  ;;  %2521 = vtanh.f32 %v1135_v28  ;;  %v3281_v11 = vmul.f32 0.5, %v3213_v7 }
 0x179   : > { %v887_v12 = vmul.f32 %v3267_v35, %v3267_v35  ;;  %v3286_v42 = vadd.f32 %v706_v18, %v3021_v16  ;;  %v3288_v13 = vpop.eup %2507  ;;  %2523 = vtanh.f32 %v1137_v30  ;;  %v3291_v44 = vmul.f32 0.5, %v3227_v39  ;;  %v710_v18 = vpop.f32.mrf.mxu0 }
 0x17a   : > { %3882 = vst [vmem:[#allocation25_spill] sm:$0xff] %v3281_v11  ;;  %v1077_v1 = vadd.f32 0.7978846, %v1013_v29  ;;  %v1016_v37 = vmul.f32 0.035677407, %v888_v4  ;;  %v1138_v50 = vmul.f32 %v1074_v22, %v3204_v26  ;;  %v3295_v38 = vmul.f32 0.5, %v3230_v43  ;;  %v823_v4 = vpop.f32.mrf.mxu1 }
 0x17b   : > { %3883 = vst [vmem:[#allocation26_spill] sm:$0xff] %v3291_v44  ;;  %v889_v28 = vmul.f32 %v3276_v55, %v3276_v55  ;;  %v3300_v11 = vadd.f32 %v819_v2, %v3023_v17  ;;  %v1140_v6 = vmul.f32 %v1076_v63, %v3213_v7  ;;  %v1139_v30 = vmul.f32 %v1075_v36, %v3227_v39 }
 0x17c   : > { %3884 = vst [vmem:[#allocation27_spill] sm:$0xff] %v3295_v38  ;;  %v3305_v44 = vmul.f32 0.5, %v3235_v8  ;;  %v1078_v29 = vadd.f32 0.7978846, %v1014_v62  ;;  %v3307_v26 = vpop.eup %2509  ;;  %v1015_v22 = vmul.f32 0.035677407, %v887_v12  ;;  %v890_v38 = vmul.f32 %v3286_v42, %v3286_v42 }
 0x17d   : > { %3886 = vst [vmem:[#allocation29_spill] sm:$0xff] %v3307_v26  ;;  %v3312_v53 = vadd.f32 %v708_v60, %v3025_v20  ;;  %v3315_v2 = vadd.f32 %v821_v59, %v3027_v21  ;;  %v3317_v7 = vpop.eup %2511  ;;  %v1141_v39 = vmul.f32 %v1077_v1, %v3230_v43  ;;  %v3321_v63 = vmul.f32 0.5, %v3248_v27 }
 0x17e   : > { %3885 = vst [vmem:[#allocation28_spill] sm:$0xff] %v3305_v44  ;;  %3887 = vst [vmem:[#allocation30_spill] sm:$0xff] %v3317_v7  ;;  %v1080_v62 = vadd.f32 0.7978846, %v1016_v37  ;;  %v3324_v36 = vadd.f32 %v710_v18, %v3021_v16  ;;  %2525 = vtanh.f32 %v1138_v50  ;;  %v1017_v12 = vmul.f32 0.035677407, %v889_v28  ;;  %v825_v7 = vpop.f32.mrf.mxu1 }
 0x17f   : > { %3888 = vst [vmem:[#allocation31_spill] sm:$0xff] %v3321_v63  ;;  %v892_v60 = vmul.f32 %v3300_v11, %v3300_v11  ;;  %v3329_v44 = vadd.f32 %v823_v4, %v3023_v17  ;;  %2527 = vtanh.f32 %v1140_v6  ;;  %v1142_v59 = vmul.f32 %v1078_v29, %v3235_v8  ;;  %v712_v29 = vpop.f32.mrf.mxu0 }
 0x180   : > { %v3333_v43 = vmul.f32 0.5, %v3267_v35  ;;  %v891_v1 = vmul.f32 %v3312_v53, %v3312_v53  ;;  %2529 = vtanh.f32 %v1139_v30  ;;  %v1079_v37 = vadd.f32 0.7978846, %v1015_v22 }
 0x181   : > { %v1018_v18 = vmul.f32 0.035677407, %v890_v38  ;;  %v893_v50 = vmul.f32 %v3315_v2, %v3315_v2  ;;  %v3339_v28 = vpop.eup %2513  ;;  %2531 = vtanh.f32 %v1141_v39  ;;  %v1144_v4 = vmul.f32 %v1080_v62, %v3248_v27 }
 0x182   : > { %3889 = vst [vmem:[#allocation32_spill] sm:$0xff] %v3333_v43  ;;  %3890 = vst [vmem:[#allocation33_spill] sm:$0xff] %v3339_v28  ;;  %v3343_v6 = vmul.f32 0.5, %v3276_v55  ;;  %v894_v8 = vmul.f32 %v3324_v36, %v3324_v36  ;;  %v3347_v63 = vpop.eup %2515  ;;  %v1081_v30 = vadd.f32 0.7978846, %v1017_v12  ;;  %v896_v38 = vmul.f32 %v3329_v44, %v3329_v44 }
 0x183   : > { %3892 = vst [vmem:[#allocation35_spill] sm:$0xff] %v3347_v63  ;;  %v1020_v22 = vmul.f32 0.035677407, %v892_v60  ;;  %v1243_v43 = vadd.f32 1.0, %v3156_v49  ;;  %v3352_v39 = vpop.eup %2517  ;;  %2533 = vtanh.f32 %v1142_v59  ;;  %v3355_v27 = vmul.f32 0.5, %v3286_v42 }
 0x184   : > { %3891 = vst [vmem:[#allocation34_spill] sm:$0xff] %v3343_v6  ;;  %3893 = vst [vmem:[#allocation36_spill] sm:$0xff] %v3352_v39  ;;  %v1019_v62 = vmul.f32 0.035677407, %v891_v1  ;;  %v1247_v6 = vadd.f32 1.0, %v3180_v61  ;;  %v3358_v26 = vpop.eup %2519  ;;  %v1143_v12 = vmul.f32 %v1079_v37, %v3267_v35  ;;  %v1245_v32 = vadd.f32 1.0, %v3169_v56  ;;  %v716_v1 = vpop.f32.mrf.mxu0 }
 0x185   : > { %3894 = vst [vmem:[#allocation37_spill] sm:$0xff] %v3355_v27  ;;  %3895 = vst [vmem:[#allocation38_spill] sm:$0xff] %v3358_v26  ;;  %v1082_v60 = vadd.f32 0.7978846, %v1018_v18  ;;  %v1021_v63 = vmul.f32 0.035677407, %v893_v50  ;;  %v3362_v15 = vpop.eup %2521  ;;  %v1307_v39 = vmul.f32 %v1243_v43, %v3069_v25  ;;  %v1145_v61 = vmul.f32 %v1081_v30, %v3276_v55  ;;  %v829_v18 = vpop.f32.mrf.mxu1 }
 0x186   : > { %v1022_v49 = vmul.f32 0.035677407, %v894_v8  ;;  %v1311_v59 = vmul.f32 %v1247_v6, %v3089_v41  ;;  %v1249_v27 = vadd.f32 1.0, %v3190_v10  ;;  %v3367_v28 = vpop.eup %2523  ;;  %v1084_v26 = vadd.f32 0.7978846, %v1020_v22  ;;  %v718_v22 = vpop.f32.mrf.mxu0 }
 0x187   : > { %3896 = vst [vmem:[#allocation39_spill] sm:$0xff] %v3367_v28  ;;  %v1024_v35 = vmul.f32 0.035677407, %v896_v38  ;;  %v713_v37 = vadd.f32 %v712_v29, %v3025_v20  ;;  %v1083_v56 = vadd.f32 0.7978846, %v1019_v62  ;;  %v1309_v8 = vmul.f32 %v1245_v32, %v3078_v23 }
 0x188   : > { %v1387_v50 = vpack.c.bf16 %v1311_v59, %v1307_v39  ;;  %v1313_v25 = vmul.f32 %v1249_v27, %v3094_v45  ;;  %v1146_v41 = vmul.f32 %v1082_v60, %v3286_v42  ;;  %v1085_v43 = vadd.f32 0.7978846, %v1021_v63 }
 0x189   : > { %v895_v10 = vmul.f32 %v713_v37, %v713_v37  ;;  %v3375_v6 = vadd.f32 %v825_v7, %v3027_v21  ;;  %v1086_v28 = vadd.f32 0.7978846, %v1022_v49  ;;  %v3378_v30 = vadd.f32 %v716_v1, %v3021_v16  ;;  %v831_v7 = vpop.f32.mrf.mxu1 }
 0x18a   : > { %1706 = vmatprep.mubr.bf16.mxu0 %v1387_v50  ;;  %v1389_v55 = vpack.c.bf16 %v1313_v25, %v1309_v8  ;;  %v3381_v29 = vadd.f32 %v829_v18, %v3023_v17  ;;  %2535 = vtanh.f32 %v1144_v4  ;;  %v1148_v23 = vmul.f32 %v1084_v26, %v3300_v11 }
 0x18b   : > { %v1088_v45 = vadd.f32 0.7978846, %v1024_v35  ;;  %v1023_v32 = vmul.f32 0.035677407, %v895_v10  ;;  %v3898_v42 = vpack.c.bf16 %v3159_v47, %v3136_v33  ;;  %v3387_v63 = vpop.eup %2525  ;;  %2537 = vtanh.f32 %v1143_v12  ;;  %v833_v35 = vpop.f32.mrf.mxu1 }
 0x18c   : > { %3897 = vst [vmem:[#allocation40_spill] sm:$0xff] %v3381_v29  ;;  %v3390_v38 = vmul.f32 0.5, %v3300_v11  ;;  %v1147_v39 = vmul.f32 %v1083_v56, %v3312_v53  ;;  %1803 = vmatprep.mubr.bf16.mxu1 %v1389_v55  ;;  %v897_v4 = vmul.f32 %v3375_v6, %v3375_v6  ;;  %v3395_v26 = vpop.eup %2527  ;;  %2539 = vtanh.f32 %v1145_v61  ;;  %v720_v61 = vpop.f32.mrf.mxu0 }
 0x18d   : > { %1707 = vmatmul.mubr.bf16.vlgmr.msra.gmra.mxu0 %v3898_v42  ;;  %v1149_v27 = vmul.f32 %v1085_v43, %v3315_v2  ;;  %v3900_v33 = vpack.c.bf16 %v3172_v58, %v3145_v40  ;;  %v898_v47 = vmul.f32 %v3378_v30, %v3378_v30  ;;  %v3404_v11 = vadd.f32 %v718_v22, %v3025_v20  ;;  %v3406_v62 = vpop.eup %2529 }
 0x18e   : > { %3899 = vst [vmem:[#allocation41_spill] sm:$0xff] %v3390_v38  ;;  %2541 = vtanh.f32 %v1146_v41  ;;  %v3409_v12 = vmul.f32 0.5, %v3312_v53  ;;  %v1150_v60 = vmul.f32 %v1086_v28, %v3324_v36  ;;  %v900_v49 = vmul.f32 %v3381_v29, %v3381_v29  ;;  %v3414_v59 = vpop.eup %2531 }
 0x18f   : > { %1804 = vmatmul.mubr.bf16.vlgmr.msra.gmra.mxu1 %v3900_v33  ;;  %2543 = vtanh.f32 %v1148_v23  ;;  %v3417_v40 = vmul.f32 0.5, %v3315_v2  ;;  %v1152_v58 = vmul.f32 %v1088_v45, %v3329_v44  ;;  %v1087_v1 = vadd.f32 0.7978846, %v1023_v32 }
 0x190   : > { %2545 = vtanh.f32 %v1147_v39  ;;  %v3421_v53 = vmul.f32 0.5, %v3324_v36  ;;  %v1025_v18 = vmul.f32 0.035677407, %v897_v4  ;;  %v3424_v28 = vadd.f32 %v831_v7, %v3027_v21  ;;  %v3426_v56 = vpop.eup %2533  ;;  %v835_v4 = vpop.f32.mrf.mxu1 }
 0x191   : > { %2547 = vtanh.f32 %v1149_v27  ;;  %v3429_v50 = vmul.f32 0.5, %v3329_v44  ;;  %v1026_v2 = vmul.f32 0.035677407, %v898_v47  ;;  %v899_v8 = vmul.f32 %v3404_v11, %v3404_v11  ;;  %v722_v44 = vpop.f32.mrf.mxu0 }
 0x192   : > { %2549 = vtanh.f32 %v1150_v60  ;;  %v1028_v25 = vmul.f32 0.035677407, %v900_v49  ;;  %v3434_v41 = vadd.f32 %v720_v61, %v3021_v16  ;;  %v3437_v36 = vadd.f32 %v833_v35, %v3023_v17 }
 0x193   : > { %2551 = vtanh.f32 %v1152_v58  ;;  %v3439_v43 = vmul.f32 0.5, %v713_v37  ;;  %v1151_v10 = vmul.f32 %v1087_v1, %v713_v37  ;;  %v3442_v55 = vmul.f32 0.5, %v3375_v6  ;;  %v726_v1 = vpop.f32.mrf.mxu0 }
 0x194   : > { %v1089_v22 = vadd.f32 0.7978846, %v1025_v18  ;;  %v3445_v23 = vmul.f32 0.5, %v3378_v30  ;;  %v901_v45 = vmul.f32 %v3424_v28, %v3424_v28  ;;  %v1251_v32 = vadd.f32 1.0, %v3215_v34 }
 0x195   : > { %v1090_v42 = vadd.f32 0.7978846, %v1026_v2  ;;  %v3451_v7 = vmul.f32 0.5, %v3404_v11  ;;  %v1027_v39 = vmul.f32 0.035677407, %v899_v8  ;;  %v1255_v37 = vadd.f32 1.0, %v3278_v3 }
 0x196   : > { %3901 = vst [vmem:[#allocation42_spill] sm:$0xff] %v3445_v23  ;;  %v1092_v27 = vadd.f32 0.7978846, %v1028_v25  ;;  %v902_v33 = vmul.f32 %v3434_v41, %v3434_v41  ;;  %v904_v47 = vmul.f32 %v3437_v36, %v3437_v36  ;;  %v1253_v60 = vadd.f32 1.0, %v3237_v19  ;;  %v839_v25 = vpop.f32.mrf.mxu1 }
 0x197   : > { %2553 = vtanh.f32 %v1151_v10  ;;  %v1315_v34 = vmul.f32 %v1251_v32, %v3105_v57  ;;  %v1319_v49 = vmul.f32 %v1255_v37, %v3139_v14  ;;  %v1257_v58 = vadd.f32 1.0, %v3288_v13  ;;  %v3462_v61 = vpop.eup %2535 }
 0x198   : > { %v1153_v3 = vmul.f32 %v1089_v22, %v3375_v6  ;;  %v1029_v35 = vmul.f32 0.035677407, %v901_v45  ;;  %v3466_v18 = vadd.f32 %v722_v44, %v3025_v20  ;;  %v3469_v2 = vadd.f32 %v835_v4, %v3027_v21  ;;  %v3471_v19 = vpop.eup %2537  ;;  %v728_v4 = vpop.f32.mrf.mxu0 }
 0x199   : > { %v1091_v8 = vadd.f32 0.7978846, %v1027_v39  ;;  %v1391_v57 = vpack.c.bf16 %v1319_v49, %v1315_v34  ;;  %v1317_v14 = vmul.f32 %v1253_v60, %v3118_v5  ;;  %v1321_v13 = vmul.f32 %v1257_v58, %v3152_v46  ;;  %v3475_v10 = vpop.eup %2539 }
 0x19a   : > { %v1154_v6 = vmul.f32 %v1090_v42, %v3378_v30  ;;  %v1030_v22 = vmul.f32 0.035677407, %v902_v33  ;;  %v1032_v45 = vmul.f32 0.035677407, %v904_v47  ;;  %v903_v44 = vmul.f32 %v3466_v18, %v3466_v18 }
 0x19b   : > { %v3480_v32 = vpop.eup %2541  ;;  %1714 = vmatprep.mubr.bf16.mxu0 %v1391_v57  ;;  %v1393_v37 = vpack.c.bf16 %v1321_v13, %v1317_v14  ;;  %v905_v39 = vmul.f32 %v3469_v2, %v3469_v2  ;;  %v1250_v5 = vadd.f32 1.0, %v3199_v24  ;;  %v1254_v46 = vadd.f32 1.0, %v3242_v51  ;;  %v841_v57 = vpop.f32.mrf.mxu1 }
 0x19c   : > { %v3486_v60 = vpop.eup %2543  ;;  %v1156_v30 = vmul.f32 %v1092_v27, %v3381_v29  ;;  %v1093_v42 = vadd.f32 0.7978846, %v1029_v35  ;;  %v1252_v33 = vadd.f32 1.0, %v3206_v31  ;;  %v1256_v47 = vadd.f32 1.0, %v3260_v48  ;;  %v3916_v29 = vld [vmem:[#allocation19_spill] sm:$0xff] }
 0x19d   : > { %v3491_v34 = vpop.eup %2545  ;;  %1811 = vmatprep.mubr.bf16.mxu1 %v1393_v37  ;;  %v1314_v49 = vmul.f32 %v1250_v5, %v3101_v52  ;;  %v1318_v58 = vmul.f32 %v1254_v46, %v3121_v0  ;;  %v3496_v24 = vadd.f32 %v726_v1, %v3021_v16  ;;  %v3499_v51 = vadd.f32 %v839_v25, %v3023_v17  ;;  %v730_v5 = vpop.f32.mrf.mxu0 }
 0x19e   : > { %v3501_v27 = vpop.eup %2547  ;;  %v1094_v35 = vadd.f32 0.7978846, %v1030_v22  ;;  %v1031_v31 = vmul.f32 0.035677407, %v903_v44  ;;  %v1316_v48 = vmul.f32 %v1252_v33, %v3103_v54  ;;  %v1320_v14 = vmul.f32 %v1256_v47, %v3124_v9 }
 0x19f   : > { %3902 = vst [vmem:[#allocation43_spill] sm:$0xff] %v3496_v24  ;;  %3903 = vst [vmem:[#allocation44_spill] sm:$0xff] %v3499_v51  ;;  %v3505_v13 = vpop.eup %2549  ;;  %v1155_v52 = vmul.f32 %v1091_v8, %v3404_v11  ;;  %v1096_v0 = vadd.f32 0.7978846, %v1032_v45  ;;  %v1033_v37 = vmul.f32 0.035677407, %v905_v39  ;;  %v1390_v1 = vpack.c.bf16 %v1318_v58, %v1314_v49  ;;  %v843_v45 = vpop.f32.mrf.mxu1 }
 0x1a0   : > { %v3508_v46 = vpop.eup %2551  ;;  %2555 = vtanh.f32 %v1153_v3  ;;  %v1392_v25 = vpack.c.bf16 %v1320_v14, %v1316_v48  ;;  %v906_v22 = vmul.f32 %v3496_v24, %v3496_v24  ;;  %v908_v54 = vmul.f32 %v3499_v51, %v3499_v51 }
 0x1a1   : > { %2557 = vtanh.f32 %v1154_v6  ;;  %v1157_v9 = vmul.f32 %v1093_v42, %v3424_v28  ;;  %1715 = vmatmul.mubr.bf16.gmra.mxu0 %v1390_v1  ;;  %v3516_v11 = vadd.f32 %v728_v4, %v3025_v20  ;;  %v3519_v8 = vadd.f32 %v841_v57, %v3027_v21 }
 0x1a2   : > { %2559 = vtanh.f32 %v1156_v30  ;;  %v1158_v3 = vmul.f32 %v1094_v35, %v3434_v41  ;;  %v1095_v44 = vadd.f32 0.7978846, %v1031_v31  ;;  %1812 = vmatmul.mubr.bf16.gmra.mxu1 %v1392_v25  ;;  %v3523_v39 = vadd.f32 %v730_v5, %v3021_v16  ;;  %v3910_v31 = vld [vmem:[#allocation33_spill] sm:$0xff]  ;;  %v845_v25 = vpop.f32.mrf.mxu1 }
 0x1a3   : > { %3904 = vst [vmem:[#allocation45_spill] sm:$0xff] %v3516_v11  ;;  %3905 = vst [vmem:[#allocation46_spill] sm:$0xff] %v3519_v8  ;;  %2561 = vtanh.f32 %v1155_v52  ;;  %v1160_v6 = vmul.f32 %v1096_v0, %v3437_v36  ;;  %v1097_v42 = vadd.f32 0.7978846, %v1033_v37  ;;  %v907_v4 = vmul.f32 %v3516_v11, %v3516_v11  ;;  %v732_v37 = vpop.f32.mrf.mxu0 }
 0x1a4   : > { %3906 = vst [vmem:[#allocation47_spill] sm:$0xff] %v3523_v39  ;;  %v3528_v33 = vpop.eup %2553  ;;  %v1034_v47 = vmul.f32 0.035677407, %v906_v22  ;;  %v1036_v49 = vmul.f32 0.035677407, %v908_v54  ;;  %v909_v30 = vmul.f32 %v3519_v8, %v3519_v8  ;;  %v3533_v58 = vadd.f32 %v843_v45, %v3023_v17  ;;  %v3912_v45 = vld [vmem:[#allocation18_spill] sm:$0xff] }
 0x1a5   : > { %v3536_v57 = vmul.f32 0.5, %v3424_v28  ;;  %2563 = vtanh.f32 %v1157_v9  ;;  %v3539_v35 = vmul.f32 0.5, %v3434_v41  ;;  %v1259_v48 = vadd.f32 1.0, %v3910_v31  ;;  %v3914_v31 = vld [vmem:[#allocation35_spill] sm:$0xff] }
 0x1a6   : > { %3907 = vst [vmem:[#allocation48_spill] sm:$0xff] %v3533_v58  ;;  %2565 = vtanh.f32 %v1158_v3  ;;  %v1159_v14 = vmul.f32 %v1095_v44, %v3466_v18  ;;  %v1035_v52 = vmul.f32 0.035677407, %v907_v4  ;;  %v910_v0 = vmul.f32 %v3523_v39, %v3523_v39  ;;  %v3913_v44 = vld [vmem:[#allocation22_spill] sm:$0xff] }
 0x1a7   : > { %3908 = vst [vmem:[#allocation49_spill] sm:$0xff] %v3536_v57  ;;  %3909 = vst [vmem:[#allocation50_spill] sm:$0xff] %v3539_v35  ;;  %v3546_v1 = vmul.f32 0.5, %v3437_v36  ;;  %2567 = vtanh.f32 %v1160_v6  ;;  %v1037_v28 = vmul.f32 0.035677407, %v909_v30  ;;  %v1263_v5 = vadd.f32 1.0, %v3362_v15 }
 0x1a8   : > { %v1161_v41 = vmul.f32 %v1097_v42, %v3469_v2  ;;  %v1098_v22 = vadd.f32 0.7978846, %v1034_v47  ;;  %v1100_v54 = vadd.f32 0.7978846, %v1036_v49  ;;  %v912_v9 = vmul.f32 %v3533_v58, %v3533_v58  ;;  %v3915_v36 = vld [vmem:[#allocation39_spill] sm:$0xff]  ;;  %v736_v42 = vpop.f32.mrf.mxu0 }
 0x1a9   : > { %3911 = vst [vmem:[#allocation33_spill] sm:$0xff] %v3546_v1  ;;  %v1323_v3 = vmul.f32 %v1259_v48, %v3912_v45  ;;  %v1327_v4 = vmul.f32 %v1263_v5, %v3913_v44  ;;  %v1261_v23 = vadd.f32 1.0, %v3914_v31  ;;  %v1265_v1 = vadd.f32 1.0, %v3915_v36  ;;  %v3917_v57 = vld [vmem:[#allocation23_spill] sm:$0xff]  ;;  %v849_v48 = vpop.f32.mrf.mxu1 }
 0x1aa   : > { %2569 = vtanh.f32 %v1159_v14  ;;  %v1099_v6 = vadd.f32 0.7978846, %v1035_v52  ;;  %v1038_v30 = vmul.f32 0.035677407, %v910_v0  ;;  %v3557_v15 = vadd.f32 %v732_v37, %v3025_v20 }
 0x1ab   : > { %v1101_v47 = vadd.f32 0.7978846, %v1037_v28  ;;  %v1395_v49 = vpack.c.bf16 %v1327_v4, %v1323_v3  ;;  %v1325_v35 = vmul.f32 %v1261_v23, %v3916_v29  ;;  %v1329_v38 = vmul.f32 %v1265_v1, %v3917_v57  ;;  %v3918_v29 = vld [vmem:[#allocation29_spill] sm:$0xff]  ;;  %v3921_v3 = vld [vmem:[#allocation30_spill] sm:$0xff]  ;;  %v738_v4 = vpop.f32.mrf.mxu0 }
 0x1ac   : > { %2571 = vtanh.f32 %v1161_v41  ;;  %v1162_v5 = vmul.f32 %v1098_v22, %v3496_v24  ;;  %v1040_v45 = vmul.f32 0.035677407, %v912_v9  ;;  %v911_v14 = vmul.f32 %v3557_v15, %v3557_v15  ;;  %v3920_v22 = vld [vmem:[#allocation36_spill] sm:$0xff] }
 0x1ad   : > { %v3564_v52 = vpop.eup %2555  ;;  %v1164_v0 = vmul.f32 %v1100_v54, %v3499_v51  ;;  %1722 = vmatprep.mubr.bf16.mxu0 %v1395_v49  ;;  %v1397_v37 = vpack.c.bf16 %v1329_v38, %v1325_v35  ;;  %v3568_v28 = vadd.f32 %v845_v25, %v3027_v21  ;;  %v1258_v23 = vadd.f32 1.0, %v3918_v29  ;;  %v3923_v25 = vld [vmem:[#allocation38_spill] sm:$0xff]  ;;  %v851_v49 = vpop.f32.mrf.mxu1  ;;  %v3924_v29 = vld [vmem:[#allocation16_spill] sm:$0xff] }
 0x1ae   : > { %v3571_v57 = vpop.eup %2557  ;;  %v1102_v1 = vadd.f32 0.7978846, %v1038_v30  ;;  %v1039_v41 = vmul.f32 0.035677407, %v911_v14  ;;  %v1262_v9 = vadd.f32 1.0, %v3920_v22  ;;  %v1260_v44 = vadd.f32 1.0, %v3921_v3 }
 0x1af   : > { %3919 = vst [vmem:[#allocation18_spill] sm:$0xff] %v3571_v57  ;;  %v3575_v31 = vpop.eup %2559  ;;  %v1163_v54 = vmul.f32 %v1099_v6, %v3516_v11  ;;  %v1165_v38 = vmul.f32 %v1101_v47, %v3519_v8  ;;  %1819 = vmatprep.mubr.bf16.mxu1 %v1397_v37  ;;  %v913_v35 = vmul.f32 %v3568_v28, %v3568_v28  ;;  %v1264_v36 = vadd.f32 1.0, %v3923_v25  ;;  %v3925_v3 = vld [vmem:[#allocation20_spill] sm:$0xff]  ;;  %v3926_v11 = vld [vmem:[#allocation17_spill] sm:$0xff] }
 0x1b0   : > { %3922 = vst [vmem:[#allocation22_spill] sm:$0xff] %v3575_v31  ;;  %v3582_v30 = vpop.eup %2561  ;;  %v1104_v14 = vadd.f32 0.7978846, %v1040_v45  ;;  %v1322_v22 = vmul.f32 %v1258_v23, %v3924_v29  ;;  %v1326_v51 = vmul.f32 %v1262_v9, %v3925_v3  ;;  %v3587_v24 = vadd.f32 %v736_v42, %v3021_v16  ;;  %v3927_v37 = vld [vmem:[#allocation21_spill] sm:$0xff]  ;;  %v740_v9 = vpop.f32.mrf.mxu0 }
 0x1b1   : > { %v1103_v6 = vadd.f32 0.7978846, %v1039_v41  ;;  %v1324_v47 = vmul.f32 %v1260_v44, %v3926_v11  ;;  %v1328_v8 = vmul.f32 %v1264_v36, %v3927_v37  ;;  %v3592_v31 = vadd.f32 %v738_v4, %v3025_v20  ;;  %v853_v44 = vpop.f32.mrf.mxu1 }
 0x1b2   : > { %v3594_v25 = vpop.eup %2563  ;;  %2573 = vtanh.f32 %v1162_v5  ;;  %v1041_v57 = vmul.f32 0.035677407, %v913_v35  ;;  %v1394_v45 = vpack.c.bf16 %v1326_v51, %v1322_v22  ;;  %v3597_v23 = vadd.f32 %v849_v48, %v3023_v17 }
 0x1b3   : > { %v3599_v29 = vpop.eup %2565  ;;  %2575 = vtanh.f32 %v1164_v0  ;;  %v1166_v42 = vmul.f32 %v1102_v1, %v3523_v39  ;;  %v1396_v11 = vpack.c.bf16 %v1328_v8, %v1324_v47  ;;  %v914_v41 = vmul.f32 %v3587_v24, %v3587_v24 }
 0x1b4   : > { %v3604_v4 = vpop.eup %2567  ;;  %v3607_v5 = vmul.f32 0.5, %v3466_v18  ;;  %2577 = vtanh.f32 %v1163_v54  ;;  %v1168_v51 = vmul.f32 %v1104_v14, %v3533_v58  ;;  %1723 = vmatmul.mubr.bf16.gmra.mxu0 %v1394_v45  ;;  %v915_v48 = vmul.f32 %v3592_v31, %v3592_v31 }
 0x1b5   : > { %2579 = vtanh.f32 %v1165_v38  ;;  %v1167_v0 = vmul.f32 %v1103_v6, %v3557_v15  ;;  %1820 = vmatmul.mubr.bf16.gmra.mxu1 %v1396_v11  ;;  %v3614_v8 = vadd.f32 %v851_v49, %v3027_v21  ;;  %v3617_v1 = vadd.f32 %v740_v9, %v3021_v16  ;;  %v742_v11 = vpop.f32.mrf.mxu0 }
 0x1b6   : > { %v1105_v35 = vadd.f32 0.7978846, %v1041_v57  ;;  %v916_v18 = vmul.f32 %v3597_v23, %v3597_v23  ;;  %v1043_v54 = vmul.f32 0.035677407, %v915_v48  ;;  %v3622_v36 = vadd.f32 %v853_v44, %v3023_v17  ;;  %v855_v48 = vpop.f32.mrf.mxu1 }
 0x1b7   : > { %v3624_v14 = vpop.eup %2569  ;;  %v3627_v38 = vmul.f32 0.5, %v3469_v2  ;;  %2581 = vtanh.f32 %v1166_v42  ;;  %v1042_v22 = vmul.f32 0.035677407, %v914_v41  ;;  %v917_v49 = vmul.f32 %v3614_v8, %v3614_v8 }
 0x1b8   : > { %2583 = vtanh.f32 %v1168_v51  ;;  %v1107_v16 = vadd.f32 0.7978846, %v1043_v54  ;;  %v918_v57 = vmul.f32 %v3617_v1, %v3617_v1  ;;  %v1267_v3 = vadd.f32 1.0, %v3406_v62  ;;  %v3928_v54 = vld [vmem:[#allocation26_spill] sm:$0xff] }
 0x1b9   : > { %v3634_v6 = vpop.eup %2571  ;;  %v3637_v17 = vmul.f32 0.5, %v3557_v15  ;;  %2585 = vtanh.f32 %v1167_v0  ;;  %v1045_v2 = vmul.f32 0.035677407, %v917_v49  ;;  %v920_v47 = vmul.f32 %v3622_v36, %v3622_v36  ;;  %v3929_v49 = vld [vmem:[#allocation32_spill] sm:$0xff] }
 0x1ba   : > { %v1169_v37 = vmul.f32 %v1105_v35, %v3568_v28  ;;  %v1044_v45 = vmul.f32 0.035677407, %v916_v18  ;;  %v1046_v9 = vmul.f32 0.035677407, %v918_v57  ;;  %v1271_v42 = vadd.f32 1.0, %v3471_v19 }
 0x1bb   : > { %v1106_v41 = vadd.f32 0.7978846, %v1042_v22  ;;  %v1171_v62 = vmul.f32 %v1107_v16, %v3592_v31  ;;  %v1109_v44 = vadd.f32 0.7978846, %v1045_v2  ;;  %v1048_v51 = vmul.f32 0.035677407, %v920_v47 }
 0x1bc   : > { %v1110_v15 = vadd.f32 0.7978846, %v1046_v9  ;;  %v1331_v0 = vmul.f32 %v1267_v3, %v3928_v54  ;;  %v1335_v58 = vmul.f32 %v1271_v42, %v3929_v49  ;;  %v1269_v39 = vadd.f32 1.0, %v3414_v59  ;;  %v3930_v47 = vld [vmem:[#allocation27_spill] sm:$0xff]  ;;  %v3931_v9 = vld [vmem:[#allocation34_spill] sm:$0xff]  ;;  %v3932_v49 = vld [vmem:[#allocation24_spill] sm:$0xff] }
 0x1bd   : > { %v1173_v35 = vmul.f32 %v1109_v44, %v3614_v8  ;;  %v1112_v18 = vadd.f32 0.7978846, %v1048_v51  ;;  %v1273_v57 = vadd.f32 1.0, %v3475_v10  ;;  %v3650_v19 = vadd.f32 %v742_v11, %v3025_v20 }
 0x1be   : > { %2587 = vtanh.f32 %v1169_v37  ;;  %v3652_v22 = vadd.f32 0.7978846, %v1044_v45  ;;  %v1399_v16 = vpack.c.bf16 %v1335_v58, %v1331_v0  ;;  %v3655_v2 = vadd.f32 %v855_v48, %v3027_v21 }
 0x1bf   : > { %v3657_v3 = vpop.eup %2573  ;;  %2589 = vtanh.f32 %v1171_v62  ;;  %v1333_v59 = vmul.f32 %v1269_v39, %v3930_v47  ;;  %v1337_v42 = vmul.f32 %v1273_v57, %v3931_v9  ;;  %v919_v10 = vmul.f32 %v3650_v19, %v3650_v19  ;;  %v3933_v47 = vld [vmem:[#allocation28_spill] sm:$0xff]  ;;  %v3934_v9 = vld [vmem:[#allocation25_spill] sm:$0xff] }
 0x1c0   : > { %v3663_v44 = vpop.eup %2575  ;;  %v1170_v20 = vmul.f32 %v1106_v41, %v3587_v24  ;;  %2591 = vtanh.f32 %v1173_v35  ;;  %v1174_v58 = vmul.f32 %v1110_v15, %v3617_v1  ;;  %1730 = vmatprep.mubr.bf16.mxu0 %v1399_v16  ;;  %v921_v21 = vmul.f32 %v3655_v2, %v3655_v2 }
 0x1c1   : > { %v3669_v37 = vpop.eup %2577  ;;  %v1176_v39 = vmul.f32 %v1112_v18, %v3622_v36  ;;  %v1401_v45 = vpack.c.bf16 %v1337_v42, %v1333_v59  ;;  %v1047_v11 = vmul.f32 0.035677407, %v919_v10  ;;  %v1266_v62 = vadd.f32 1.0, %v3387_v63 }
 0x1c2   : > { %v3673_v51 = vpop.eup %2579  ;;  %v1049_v48 = vmul.f32 0.035677407, %v921_v21  ;;  %v1270_v41 = vadd.f32 1.0, %v3426_v56  ;;  %v1268_v54 = vadd.f32 1.0, %v3395_v26  ;;  %v1272_v15 = vadd.f32 1.0, %v3462_v61  ;;  %v3935_v56 = vld [vmem:[#allocation31_spill] sm:$0xff] }
 0x1c3   : > { %1827 = vmatprep.mubr.bf16.mxu1 %v1401_v45  ;;  %v1111_v0 = vadd.f32 0.7978846, %v1047_v11  ;;  %v1330_v35 = vmul.f32 %v1266_v62, %v3932_v49  ;;  %v1275_v57 = vadd.f32 1.0, %v3491_v34  ;;  %v1279_v18 = vadd.f32 1.0, %v3528_v33 }
 0x1c4   : > { %v3681_v16 = vpop.eup %2581  ;;  %v1113_v63 = vadd.f32 0.7978846, %v1049_v48  ;;  %v1334_v59 = vmul.f32 %v1270_v41, %v3933_v47  ;;  %v1332_v42 = vmul.f32 %v1268_v54, %v3934_v9  ;;  %v1336_v10 = vmul.f32 %v1272_v15, %v3935_v56 }
 0x1c5   : > { %v3686_v26 = vpop.eup %2583  ;;  %v1175_v61 = vmul.f32 %v1111_v0, %v3650_v19  ;;  %v1339_v21 = vmul.f32 %v1275_v57, %v3409_v12  ;;  %v1343_v45 = vmul.f32 %v1279_v18, %v3439_v43  ;;  %v1277_v34 = vadd.f32 1.0, %v3501_v27 }
 0x1c6   : > { %v2586_v33 = vpop.eup %2585  ;;  %v1177_v11 = vmul.f32 %v1113_v63, %v3655_v2  ;;  %v1398_v62 = vpack.c.bf16 %v1334_v59, %v1330_v35  ;;  %v1400_v48 = vpack.c.bf16 %v1336_v10, %v1332_v42  ;;  %v1281_v41 = vadd.f32 1.0, %v3564_v52  ;;  %v3938_v59 = vld [vmem:[#allocation49_spill] sm:$0xff]  ;;  %v3939_v42 = vld [vmem:[#allocation18_spill] sm:$0xff] }
 0x1c7   : > { %2593 = vtanh.f32 %v1175_v61  ;;  %v1403_v54 = vpack.c.bf16 %v1343_v45, %v1339_v21  ;;  %v1341_v15 = vmul.f32 %v1277_v34, %v3417_v40  ;;  %v1274_v49 = vadd.f32 1.0, %v3480_v32 }
 0x1c8   : > { %2595 = vtanh.f32 %v1177_v11  ;;  %1731 = vmatmul.mubr.bf16.gmra.mxu0 %v1398_v62  ;;  %1828 = vmatmul.mubr.bf16.gmra.mxu1 %v1400_v48  ;;  %v1345_v12 = vmul.f32 %v1281_v41, %v3442_v55  ;;  %v1278_v43 = vadd.f32 1.0, %v3505_v13  ;;  %v1276_v27 = vadd.f32 1.0, %v3486_v60  ;;  %v3941_v11 = vld [vmem:[#allocation45_spill] sm:$0xff]  ;;  %v3942_v48 = vld [vmem:[#allocation46_spill] sm:$0xff] }
 0x1c9   : > { %2597 = vtanh.f32 %v1170_v20  ;;  %1738 = vmatprep.mubr.bf16.mxu0 %v1403_v54  ;;  %v1280_v0 = vadd.f32 1.0, %v3508_v46  ;;  %v1283_v52 = vadd.f32 1.0, %v3582_v30  ;;  %v1287_v35 = vadd.f32 1.0, %v3624_v14  ;;  %v3936_v14 = vld [vmem:[#allocation37_spill] sm:$0xff] }
 0x1ca   : > { %2599 = vtanh.f32 %v1174_v58  ;;  %v1405_v40 = vpack.c.bf16 %v1345_v12, %v1341_v15  ;;  %v1342_v32 = vmul.f32 %v1278_v43, %v3421_v53  ;;  %v1285_v57 = vadd.f32 1.0, %v3594_v25  ;;  %v3937_v53 = vld [vmem:[#allocation41_spill] sm:$0xff]  ;;  %v3946_v12 = vld [vmem:[#allocation42_spill] sm:$0xff] }
 0x1cb   : > { %v2588_v18 = vpop.eup %2587  ;;  %v1344_v55 = vmul.f32 %v1280_v0, %v3429_v50  ;;  %v1347_v13 = vmul.f32 %v1283_v52, %v3451_v7  ;;  %v1351_v60 = vmul.f32 %v1287_v35, %v3607_v5  ;;  %v1289_v20 = vadd.f32 1.0, %v3634_v6  ;;  %v3945_v15 = vld [vmem:[#allocation33_spill] sm:$0xff] }
 0x1cc   : > { %v2590_v46 = vpop.eup %2589  ;;  %v1172_v30 = vmul.f32 %v3652_v22, %v3597_v23  ;;  %2601 = vtanh.f32 %v1176_v39  ;;  %1835 = vmatprep.mubr.bf16.mxu1 %v1405_v40  ;;  %v1338_v58 = vmul.f32 %v1274_v49, %v3936_v14  ;;  %v1340_v63 = vmul.f32 %v1276_v27, %v3937_v53 }
 0x1cd   : > { %v2592_v25 = vpop.eup %2591  ;;  %v1407_v47 = vpack.c.bf16 %v1351_v60, %v1347_v13  ;;  %v1349_v50 = vmul.f32 %v1285_v57, %v3938_v59  ;;  %v1353_v7 = vmul.f32 %v1289_v20, %v3627_v38  ;;  %v1286_v5 = vadd.f32 1.0, %v3599_v29  ;;  %v3940_v38 = vld [vmem:[#allocation22_spill] sm:$0xff]  ;;  %v3947_v59 = vld [vmem:[#allocation47_spill] sm:$0xff] }
 0x1ce   : > { %v1402_v9 = vpack.c.bf16 %v1342_v32, %v1338_v58  ;;  %v1404_v6 = vpack.c.bf16 %v1344_v55, %v1340_v63  ;;  %v1282_v56 = vadd.f32 1.0, %v3939_v42  ;;  %v1288_v22 = vadd.f32 1.0, %v3604_v4  ;;  %v3943_v4 = vld [vmem:[#allocation50_spill] sm:$0xff] }
 0x1cf   : > { %v1409_v39 = vpack.c.bf16 %v1353_v7, %v1349_v50  ;;  %v1291_v10 = vadd.f32 1.0, %v3669_v37  ;;  %v1295_v61 = vadd.f32 1.0, %v2586_v33  ;;  %v1293_v21 = vadd.f32 1.0, %v3673_v51  ;;  %v3944_v33 = vld [vmem:[#allocation40_spill] sm:$0xff] }
 0x1d0   : > { %v977_v45 = vmul.f32 0.5, %v3568_v28  ;;  %2603 = vtanh.f32 %v1172_v30  ;;  %1739 = vmatmul.mubr.bf16.gmra.mxu0 %v1402_v9  ;;  %1836 = vmatmul.mubr.bf16.gmra.mxu1 %v1404_v6  ;;  %v1284_v34 = vadd.f32 1.0, %v3940_v38  ;;  %v1297_v29 = vadd.f32 1.0, %v2588_v18  ;;  %v3948_v7 = vld [vmem:[#allocation48_spill] sm:$0xff] }
 0x1d1   : > { %v971_v62 = vmul.f32 0.5, %v3941_v11  ;;  %v973_v41 = vmul.f32 0.5, %v3942_v48  ;;  %1746 = vmatprep.mubr.bf16.mxu0 %v1407_v47  ;;  %1843 = vmatprep.mubr.bf16.mxu1 %v1409_v39  ;;  %v1350_v54 = vmul.f32 %v1286_v5, %v3943_v4  ;;  %v1359_v37 = vmul.f32 %v1295_v61, %v3637_v17 }
 0x1d2   : > { %v964_v51 = vmul.f32 0.5, %v3944_v33  ;;  %v1352_v28 = vmul.f32 %v1288_v22, %v3945_v15  ;;  %v1361_v49 = vmul.f32 %v1297_v29, %v977_v45  ;;  %v1346_v43 = vmul.f32 %v1282_v56, %v3946_v12  ;;  %v3950_v56 = vld [vmem:[#allocation44_spill] sm:$0xff] }
 0x1d3   : > { %v1355_v27 = vmul.f32 %v1291_v10, %v971_v62  ;;  %v1357_v0 = vmul.f32 %v1293_v21, %v973_v41  ;;  %v1294_v17 = vadd.f32 1.0, %v3681_v16  ;;  %v1296_v20 = vadd.f32 1.0, %v3686_v26 }
 0x1d4   : > { %v2594_v52 = vpop.eup %2593  ;;  %v1348_v35 = vmul.f32 %v1284_v34, %v964_v51  ;;  %v1406_v32 = vpack.c.bf16 %v1350_v54, %v1346_v43  ;;  %v983_v58 = vmul.f32 0.5, %v3650_v19  ;;  %v985_v53 = vmul.f32 0.5, %v3655_v2 }
 0x1d5   : > { %v2596_v40 = vpop.eup %2595  ;;  %v1411_v57 = vpack.c.bf16 %v1359_v37, %v1355_v27  ;;  %v1413_v18 = vpack.c.bf16 %v1361_v49, %v1357_v0  ;;  %v1303_v55 = vadd.f32 1.0, %v2594_v52  ;;  %v1299_v63 = vadd.f32 1.0, %v2590_v46  ;;  %v3949_v46 = vld [vmem:[#allocation43_spill] sm:$0xff] }
 0x1d6   : > { %v2598_v13 = vpop.eup %2597  ;;  %v1408_v60 = vpack.c.bf16 %v1352_v28, %v1348_v35  ;;  %v1305_v30 = vadd.f32 1.0, %v2596_v40  ;;  %v1301_v47 = vadd.f32 1.0, %v2592_v25  ;;  %v974_v50 = vmul.f32 0.5, %v3947_v59 }
 0x1d7   : > { %v2600_v14 = vpop.eup %2599  ;;  %v976_v5 = vmul.f32 0.5, %v3948_v7  ;;  %v1290_v9 = vadd.f32 1.0, %v3657_v3  ;;  %v1292_v16 = vadd.f32 1.0, %v3663_v44  ;;  %v979_v26 = vmul.f32 0.5, %v3592_v31 }
 0x1d8   : > { %1747 = vmatmul.mubr.bf16.gmra.mxu0 %v1406_v32  ;;  %1844 = vmatmul.mubr.bf16.gmra.mxu1 %v1408_v60  ;;  %v981_v42 = vmul.f32 0.5, %v3614_v8  ;;  %v1367_v19 = vmul.f32 %v1303_v55, %v983_v58  ;;  %v1369_v2 = vmul.f32 %v1305_v30, %v985_v53  ;;  %v970_v25 = vmul.f32 0.5, %v3949_v46 }
 0x1d9   : > { %v2602_v6 = vpop.eup %2601  ;;  %1754 = vmatprep.mubr.bf16.mxu0 %v1411_v57  ;;  %1851 = vmatprep.mubr.bf16.mxu1 %v1413_v18  ;;  %v972_v22 = vmul.f32 0.5, %v3950_v56  ;;  %v1358_v39 = vmul.f32 %v1294_v17, %v974_v50  ;;  %v1360_v10 = vmul.f32 %v1296_v20, %v976_v5  ;;  %v1363_v61 = vmul.f32 %v1299_v63, %v979_v26 }
 0x1da   : > { %v1365_v21 = vmul.f32 %v1301_v47, %v981_v42  ;;  %v1354_v3 = vmul.f32 %v1290_v9, %v970_v25  ;;  %v1302_v8 = vadd.f32 1.0, %v2600_v14  ;;  %v1304_v11 = vadd.f32 1.0, %v2602_v6 }
 0x1db   : > { %v1356_v45 = vmul.f32 %v1292_v16, %v972_v22  ;;  %v1415_v38 = vpack.c.bf16 %v1367_v19, %v1363_v61  ;;  %v982_v62 = vmul.f32 0.5, %v3617_v1  ;;  %v984_v48 = vmul.f32 0.5, %v3622_v36 }
 0x1dc   : > { %v1417_v34 = vpack.c.bf16 %v1369_v2, %v1365_v21  ;;  %v1410_v31 = vpack.c.bf16 %v1358_v39, %v1354_v3  ;;  %v1298_v41 = vadd.f32 1.0, %v2598_v13  ;;  %v978_v54 = vmul.f32 0.5, %v3587_v24  ;;  %v3748_v24 = vld [vmem:[%s3843_s4] ss:$0 sm:$0xff] }
 0x1dd   : > { %v2604_v44 = vpop.eup %2603  ;;  %v1412_v29 = vpack.c.bf16 %v1360_v10, %v1356_v45  ;;  %v980_v37 = vmul.f32 0.5, %v3597_v23  ;;  %v1366_v33 = vmul.f32 %v1302_v8, %v982_v62  ;;  %v1368_v51 = vmul.f32 %v1304_v11, %v984_v48 }
 0x1de   : > { %v1300_v4 = vadd.f32 1.0, %v2604_v44  ;;  %v1362_v15 = vmul.f32 %v1298_v41, %v978_v54 }
 0x1e0   : > { %1755 = vmatmul.mubr.bf16.gmra.mxu0 %v1410_v31  ;;  %1852 = vmatmul.mubr.bf16.gmra.mxu1 %v1412_v29  ;;  %v1364_v28 = vmul.f32 %v1300_v4, %v980_v37  ;;  %v1414_v49 = vpack.c.bf16 %v1366_v33, %v1362_v15 }
 0x1e1   : > { %1762 = vmatprep.mubr.bf16.mxu0 %v1415_v38  ;;  %1859 = vmatprep.mubr.bf16.mxu1 %v1417_v34 }
 0x1e2   : > { %v1416_v12 = vpack.c.bf16 %v1368_v51, %v1364_v28 }
 0x1e8   : > { %1763 = vmatmul.mubr.bf16.gmra.mxu0 %v1414_v49  ;;  %1860 = vmatmul.mubr.bf16.gmra.mxu1 %v1416_v12 }
 0x24d   : > { %v2177_v1 = vpop.f32.mrf.mxu0 }
 0x24f   : > { %v2241_v36 = vpop.f32.mrf.mxu1  ;;  %v2178_v43 = vpop.f32.mrf.mxu0 }
 0x250   : > { %v2179_v27 = vadd.f32 %v2178_v43, %v2177_v1 }
 0x251   : > { %v2242_v0 = vpop.f32.mrf.mxu1  ;;  %v2180_v52 = vpop.f32.mrf.mxu0 }
 0x252   : > { %v2243_v35 = vadd.f32 %v2242_v0, %v2241_v36 }
 0x253   : > { %v2244_v23 = vpop.f32.mrf.mxu1  ;;  %v2181_v40 = vpop.f32.mrf.mxu0 }
 0x254   : > { %v1806_v32 = vadd.f32 %v2243_v35, %v2179_v27  ;;  %v2182_v57 = vadd.f32 %v2181_v40, %v2180_v52 }
 0x255   : > { %v2245_v18 = vpop.f32.mrf.mxu1 }
 0x256   : > { %v1868_v55 = vadd.f32 %v3748_v24, %v1806_v32  ;;  %v2246_v13 = vadd.f32 %v2245_v18, %v2244_v23 }
 0x258   : > { %1919 = vst [vmem:[%s3751_s9] sm:$0xff] %v1868_v55  ;;  %v1809_v60 = vadd.f32 %v2246_v13, %v2182_v57 }
 0x25a   : > { %v1869_v17 = vadd.f32 %v3748_v24, %v1809_v60 }
 0x25c   : > { %1920 = vst [vmem:[%s3751_s9 + $0x8] sm:$0xff] %v1869_v17 }
 0x261   : > { %v2183_v20 = vpop.f32.mrf.mxu0 }
 0x262   : > { %v2247_v30 = vpop.f32.mrf.mxu1 }
 0x263   : > { %v2184_v14 = vpop.f32.mrf.mxu0 }
 0x264   : > { %v2185_v58 = vadd.f32 %v2184_v14, %v2183_v20  ;;  %v2248_v53 = vpop.f32.mrf.mxu1 }
 0x265   : > { %v2249_v63 = vadd.f32 %v2248_v53, %v2247_v30  ;;  %v2186_v47 = vpop.f32.mrf.mxu0 }
 0x266   : > { %v2250_v59 = vpop.f32.mrf.mxu1 }
 0x267   : > { %v1814_v50 = vadd.f32 %v2249_v63, %v2185_v58  ;;  %v2187_v7 = vpop.f32.mrf.mxu0 }
 0x268   : > { %v2188_v5 = vadd.f32 %v2187_v7, %v2186_v47  ;;  %v2251_v9 = vpop.f32.mrf.mxu1 }
 0x269   : > { %v1870_v16 = vadd.f32 %v3748_v24, %v1814_v50  ;;  %v2252_v6 = vadd.f32 %v2251_v9, %v2250_v59 }
 0x26b   : > { %1921 = vst [vmem:[%s3751_s9 + $0x10] sm:$0xff] %v1870_v16  ;;  %v1817_v26 = vadd.f32 %v2252_v6, %v2188_v5 }
 0x26d   : > { %v1871_v42 = vadd.f32 %v3748_v24, %v1817_v26 }
 0x26f   : > { %1922 = vst [vmem:[%s3751_s9 + $0x18] sm:$0xff] %v1871_v42 }
 0x274   : > { %v2189_v19 = vpop.f32.mrf.mxu0 }
 0x275   : > { %v2253_v2 = vpop.f32.mrf.mxu1 }
 0x276   : > { %v2190_v46 = vpop.f32.mrf.mxu0 }
 0x277   : > { %v2191_v25 = vadd.f32 %v2190_v46, %v2189_v19  ;;  %v2254_v56 = vpop.f32.mrf.mxu1 }
 0x278   : > { %v2255_v22 = vadd.f32 %v2254_v56, %v2253_v2  ;;  %v2192_v39 = vpop.f32.mrf.mxu0 }
 0x279   : > { %v2256_v10 = vpop.f32.mrf.mxu1 }
 0x27a   : > { %v1822_v61 = vadd.f32 %v2255_v22, %v2191_v25  ;;  %v2193_v21 = vpop.f32.mrf.mxu0 }
 0x27b   : > { %v2194_v3 = vadd.f32 %v2193_v21, %v2192_v39  ;;  %v2257_v45 = vpop.f32.mrf.mxu1 }
 0x27c   : > { %v1872_v44 = vadd.f32 %v3748_v24, %v1822_v61  ;;  %v2258_v38 = vadd.f32 %v2257_v45, %v2256_v10 }
 0x27e   : > { %1923 = vst [vmem:[%s3751_s9 + $0x20] sm:$0xff] %v1872_v44  ;;  %v1825_v34 = vadd.f32 %v2258_v38, %v2194_v3 }
 0x280   : > { %v1873_v31 = vadd.f32 %v3748_v24, %v1825_v34 }
 0x282   : > { %1924 = vst [vmem:[%s3751_s9 + $0x28] sm:$0xff] %v1873_v31 }
 0x288   : > { %v2195_v29 = vpop.f32.mrf.mxu0  ;;  %v2259_v8 = vpop.f32.mrf.mxu1 }
 0x28a   : > { %v2196_v11 = vpop.f32.mrf.mxu0  ;;  %v2260_v62 = vpop.f32.mrf.mxu1 }
 0x28b   : > { %v2197_v48 = vadd.f32 %v2196_v11, %v2195_v29  ;;  %v2261_v41 = vadd.f32 %v2260_v62, %v2259_v8 }
 0x28c   : > { %v2198_v4 = vpop.f32.mrf.mxu0  ;;  %v2262_v54 = vpop.f32.mrf.mxu1 }
 0x28d   : > { %v1830_v37 = vadd.f32 %v2261_v41, %v2197_v48 }
 0x28e   : > { %v2199_v33 = vpop.f32.mrf.mxu0  ;;  %v2263_v51 = vpop.f32.mrf.mxu1 }
 0x28f   : > { %v1874_v15 = vadd.f32 %v3748_v24, %v1830_v37  ;;  %v2200_v28 = vadd.f32 %v2199_v33, %v2198_v4  ;;  %v2264_v49 = vadd.f32 %v2263_v51, %v2262_v54 }
 0x290   : > { %v2201_v12 = vpop.f32.mrf.mxu0  ;;  %v2265_v1 = vpop.f32.mrf.mxu1 }
 0x291   : > { %1925 = vst [vmem:[%s3751_s9 + $0x30] sm:$0xff] %v1874_v15  ;;  %v1833_v36 = vadd.f32 %v2264_v49, %v2200_v28 }
 0x292   : > { %v2202_v43 = vpop.f32.mrf.mxu0  ;;  %v2266_v27 = vpop.f32.mrf.mxu1 }
 0x293   : > { %v1875_v0 = vadd.f32 %v3748_v24, %v1833_v36  ;;  %v2203_v52 = vadd.f32 %v2202_v43, %v2201_v12  ;;  %v2267_v35 = vadd.f32 %v2266_v27, %v2265_v1 }
 0x294   : > { %v2204_v23 = vpop.f32.mrf.mxu0  ;;  %v2268_v40 = vpop.f32.mrf.mxu1 }
 0x295   : > { %1926 = vst [vmem:[%s3751_s9 + $0x38] sm:$0xff] %v1875_v0  ;;  %v1838_v32 = vadd.f32 %v2267_v35, %v2203_v52 }
 0x296   : > { %v2205_v57 = vpop.f32.mrf.mxu0  ;;  %v2269_v18 = vpop.f32.mrf.mxu1 }
 0x297   : > { %v1876_v55 = vadd.f32 %v3748_v24, %v1838_v32  ;;  %v2206_v13 = vadd.f32 %v2205_v57, %v2204_v23  ;;  %v2270_v60 = vadd.f32 %v2269_v18, %v2268_v40 }
 0x298   : > { %v2207_v17 = vpop.f32.mrf.mxu0  ;;  %v2271_v20 = vpop.f32.mrf.mxu1 }
 0x299   : > { %1927 = vst [vmem:[%s3751_s9 + $0x40] sm:$0xff] %v1876_v55  ;;  %v1841_v30 = vadd.f32 %v2270_v60, %v2206_v13 }
 0x29a   : > { %v2208_v14 = vpop.f32.mrf.mxu0  ;;  %v2272_v58 = vpop.f32.mrf.mxu1 }
 0x29b   : > { %v1877_v53 = vadd.f32 %v3748_v24, %v1841_v30  ;;  %v2209_v63 = vadd.f32 %v2208_v14, %v2207_v17  ;;  %v2273_v47 = vadd.f32 %v2272_v58, %v2271_v20 }
 0x29c   : > { %v2210_v59 = vpop.f32.mrf.mxu0  ;;  %v2274_v50 = vpop.f32.mrf.mxu1 }
 0x29d   : > { %1928 = vst [vmem:[%s3751_s9 + $0x48] sm:$0xff] %v1877_v53  ;;  %v1846_v7 = vadd.f32 %v2273_v47, %v2209_v63 }
 0x29e   : > { %v2211_v5 = vpop.f32.mrf.mxu0  ;;  %v2275_v9 = vpop.f32.mrf.mxu1 }
 0x29f   : > { %v1878_v16 = vadd.f32 %v3748_v24, %v1846_v7  ;;  %v2212_v6 = vadd.f32 %v2211_v5, %v2210_v59  ;;  %v2276_v26 = vadd.f32 %v2275_v9, %v2274_v50 }
 0x2a0   : > { %v2213_v42 = vpop.f32.mrf.mxu0  ;;  %v2277_v19 = vpop.f32.mrf.mxu1 }
 0x2a1   : > { %1929 = vst [vmem:[%s3751_s9 + $0x50] sm:$0xff] %v1878_v16  ;;  %v1849_v2 = vadd.f32 %v2276_v26, %v2212_v6 }
 0x2a2   : > { %v2214_v46 = vpop.f32.mrf.mxu0  ;;  %v2278_v25 = vpop.f32.mrf.mxu1 }
 0x2a3   : > { %v1879_v56 = vadd.f32 %v3748_v24, %v1849_v2  ;;  %v2215_v22 = vadd.f32 %v2214_v46, %v2213_v42  ;;  %v2279_v39 = vadd.f32 %v2278_v25, %v2277_v19 }
 0x2a4   : > { %v2216_v10 = vpop.f32.mrf.mxu0  ;;  %v2280_v61 = vpop.f32.mrf.mxu1 }
 0x2a5   : > { %1930 = vst [vmem:[%s3751_s9 + $0x58] sm:$0xff] %v1879_v56  ;;  %v1854_v21 = vadd.f32 %v2279_v39, %v2215_v22 }
 0x2a6   : > { %v2217_v3 = vpop.f32.mrf.mxu0  ;;  %v2281_v45 = vpop.f32.mrf.mxu1 }
 0x2a7   : > { %v1880_v44 = vadd.f32 %v3748_v24, %v1854_v21  ;;  %v2218_v38 = vadd.f32 %v2217_v3, %v2216_v10  ;;  %v2282_v34 = vadd.f32 %v2281_v45, %v2280_v61 }
 0x2a8   : > { %v2219_v31 = vpop.f32.mrf.mxu0  ;;  %v2283_v29 = vpop.f32.mrf.mxu1 }
 0x2a9   : > { %1931 = vst [vmem:[%s3751_s9 + $0x60] sm:$0xff] %v1880_v44  ;;  %v1857_v8 = vadd.f32 %v2282_v34, %v2218_v38 }
 0x2aa   : > { %v2220_v11 = vpop.f32.mrf.mxu0  ;;  %v2284_v62 = vpop.f32.mrf.mxu1 }
 0x2ab   : > { %v1881_v48 = vadd.f32 %v3748_v24, %v1857_v8  ;;  %v2221_v41 = vadd.f32 %v2220_v11, %v2219_v31  ;;  %v2285_v4 = vadd.f32 %v2284_v62, %v2283_v29 }
 0x2ac   : > { %v2222_v54 = vpop.f32.mrf.mxu0  ;;  %v2286_v37 = vpop.f32.mrf.mxu1 }
 0x2ad   : > { %1932 = vst [vmem:[%s3751_s9 + $0x68] sm:$0xff] %v1881_v48  ;;  %v1862_v33 = vadd.f32 %v2285_v4, %v2221_v41 }
 0x2ae   : > { %v2223_v51 = vpop.f32.mrf.mxu0  ;;  %v2287_v15 = vpop.f32.mrf.mxu1 }
 0x2af   : > { %v1882_v28 = vadd.f32 %v3748_v24, %v1862_v33  ;;  %v2224_v49 = vadd.f32 %v2223_v51, %v2222_v54  ;;  %v2288_v12 = vadd.f32 %v2287_v15, %v2286_v37 }
 0x2b1   : > { %1933 = vst [vmem:[%s3751_s9 + $0x70] sm:$0xff] %v1882_v28  ;;  %v1865_v1 = vadd.f32 %v2288_v12, %v2224_v49 }
 0x2b3   : > { %v1883_v36 = vadd.f32 %v3748_v24, %v1865_v1 }
 0x2b5   : > { %1934 = vst [vmem:[%s3751_s9 + $0x78] sm:$0xff] %v1883_v36 }
 0x2b6   : > { %2724 = shalt.err (!%p2721_p13)
}
 0x2b7   : > { %s2725_s7 = scalar_lea.hbm %s3787_s14, 2048  ;;  %s2729_s28 = scalar_lea.hbm %s3844_s5, 4096 }
 0x2b8   : > { %p2726_p1 = scmp.ne.s32.totalorder %s3787_s14, %s2725_s7  ;;  %p2730_p12 = scmp.lt.s32.totalorder %s3787_s14, %s3844_s5 }
 0x2b9   : > { %p2731_p5 = scmp.lt.s32.totalorder %s2729_s28, %s2725_s7 }
 0x2ba   : > { %p2727_p4 = pnand %p2726_p1, %p2946_p0 }
 0x2bb   : > { %p2732_p3 = por %p2731_p5, %p2730_p12 }
 0x2bc   : > { %p2728_p8 = pneg %p2727_p4 }
 0x2be   : > { %p2733_p10 = pnand %p2732_p3, %p2728_p8 }
 0x2c0   : > { %2736 = shalt.err (!%p2733_p10)
}
 0x2c1   : > { %s2811_s10 = smov 128   ;;  %s2812_s13 = smov 8  }
 0x2c2   : > { %2303 = dma.vmem_to_hbm [thread:$0]  (%p2946_p0), %s3789_s27, 2048, %s3787_s14, %s1936_s24, %s2811_s10, %s2811_s10, %s2812_s13  }
 0x2c3 PF: > { %s1964_s17 = sand.u32 1, %s2779_s18   ;;  %p3951_p2 = scmp.ne.s32.totalorder %s3862_s29, 0 }
 0x2c4   : > { %p3952_p11 = scmp.ge.s32.totalorder %s2799_s23, 2  ;;  %s1965_s12 = scalar_lea.sflag [#allocation5], %s1964_s17 }
 0x2c6   : > { %p2320_p7 = pnand %p3952_p11, %p3951_p2 }
 0x2c8   : > { %p2321_p6 = pneg %p2320_p7 }
 0x2ca   : > { %2774 = dma.done.wait (%p2321_p6), %s1965_s12, 2048  }
 0x2cb   : > { %2776 = vsyncadd (%p2321_p6), %s1965_s12, 4294965248  ;;  %s23_s23 = sadd.s32 1, %s2799_s23   ;;  %s3953_s18 = smov %s2783_s19 }
 0x2cc   : > { %p20_p9 = scmp.ge.s32.totalorder %s23_s23, 4   ;;  %s3954_s19 = smov %s2787_s20 }
 0x2cd   : > { %s3955_s20 = smov %s2958_s25  ;;  %s3956_s21 = smov %s2795_s22 }
 0x2ce   : > { %s3957_s22 = smov %s3959_s15  ;;  %22 = sbr.rel (!%p20_p9) target bundleno = 10 (0xa), region = 108 }
 0x2d3   :  { %1970 = vsyncpa [#allocation4], 1 }
 0x2d4   :  { %1972 = vsyncpa [#allocation4 + $0x1], 1 }
 0x2d5   :  { %1973 = vsyncpa [#allocation7], 1 }
 0x2d6   :  { %1974 = vsyncpa [#allocation10], 1 }
 0x2d7   :  { %1975 = vsyncpa [#allocation5], 1 }
 0x2d8   :  { %1977 = vsyncpa [#allocation5 + $0x1], 1 }

</bundles_post_ra>
